<compile_context>
chip_gen: v7x
topology: tpu7x:2x2x1
jax: 0.10.0
libtpu: 0.0.40
codegen_flags: <defaults>
</compile_context>

<pallas_src>
from functools import partial

import jax
import jax.numpy as jnp
from jax.experimental import pallas as pl
from jax.experimental.pallas import tpu as pltpu


def _circ_shift(x, shift):
    """result[..., w] = x[..., (w - shift) % W]  (jnp.roll semantics)."""
    w = x.shape[-1]
    shift = shift % w
    if shift == 0:
        return x
    if w % 128 == 0:
        # lane-aligned width: XLU rotate, no vld/vst copies
        return pltpu.roll(x, shift=shift, axis=x.ndim - 1)
    # fallback for non-lane-aligned widths (correct everywhere, costs copies)
    return jnp.concatenate([x[..., w - shift:], x[..., :w - shift]], axis=-1)


def _conv_rows(x, wbig, *, kw, dil, pad):
    """Dilated circular conv with kernel_h folded into the output rows.

    x    : (BB, Cin*H, W)          input block (f32)
    wbig : (KW, Cout*Hout, Cin*H)  expanded weights (compute dtype)
    returns (BB, Cout*Hout, W) float32   (conv bias intentionally omitted)
    """
    bb, _, w = x.shape
    couthout = wbig.shape[1]
    cdtype = wbig.dtype

    accs = [jnp.zeros((couthout, w), jnp.float32) for _ in range(bb)]
    for j in range(kw):
        # tap j of the circular window: rolled copy, W stays on the lane axis
        xr = _circ_shift(x, pad - j * dil).astype(cdtype)
        wj = wbig[j]                                        # (Cout*Hout, Cin*H)
        for b in range(bb):
            accs[b] = accs[b] + jnp.dot(wj, xr[b],
                                        preferred_element_type=jnp.float32)
    return jnp.stack(accs, axis=0)                          # (BB, Cout*Hout, W)


def _conv_stats_kernel(x_ref, w_ref, stats_ref, *, kw, dil, pad):
    """Pass 1: conv for one batch block -> per-block partial BN statistics."""
    y = _conv_rows(x_ref[...], w_ref[...], kw=kw, dil=dil, pad=pad)
    ysum = jnp.sum(y, axis=0)                               # (Cout*Hout, W)
    ysq = jnp.sum(y * y, axis=0)
    stats_ref[:, 0:1] = jnp.sum(ysum, axis=1, keepdims=True)
    stats_ref[:, 1:2] = jnp.sum(ysq, axis=1, keepdims=True)


def _conv_bn_lrelu_kernel(x_ref, w_ref, scale_ref, shift_ref, out_ref, *,
                          kw, dil, pad, neg_slope):
    """Pass 2: recompute conv, apply affine BN + LeakyReLU, one full-block store."""
    y = _conv_rows(x_ref[...], w_ref[...], kw=kw, dil=dil, pad=pad)
    z = y * scale_ref[...][None, :, :] + shift_ref[...][None, :, :]
    out_ref[...] = jnp.where(z > 0, z, neg_slope * z).astype(out_ref.dtype)


def _pick_batch_block(batch, cinh, couthout, w, *, max_bb,
                      vmem_budget_bytes=4 * 1024 * 1024):
    """Largest divisor of `batch` whose per-step VMEM footprint fits the budget.

    The budget is conservative so the same choice is safe on v7x (64 MiB VMEM) as
    well as v5e/v6e (128 MiB), with double-buffering headroom left for Pallas.
    """
    per_elem = 4 * w * (3 * cinh + 3 * couthout)            # f32, rough upper bound
    bb = 1
    for d in range(1, min(batch, max_bb) + 1):
        if batch % d == 0 and d * per_elem <= vmem_budget_bytes:
            bb = d
    return bb


@partial(jax.jit, static_argnames=("kernel_h", "n_adj", "dilation", "eps",
                                   "neg_slope", "compute_dtype", "max_batch_block"))
def basic_block2d(x, weight, bias, gamma, beta, *, kernel_h, n_adj, dilation,
                  eps=1e-5, neg_slope=0.01, compute_dtype=jnp.bfloat16,
                  max_batch_block=8):
    """Forward of BasicBlock2d with conv_type='dgrid2d'.  x: (B, Cin, H, W) NCHW."""
    # Conv bias not applied: exactly cancelled by training-mode BN mean subtraction.
    del bias

    B, Cin, H, W = x.shape
    Cout = weight.shape[0]
    KH, KW = kernel_h, 2 * n_adj + 1
    dil = dilation
    pad = n_adj * dil
    Hout = H - (KH - 1) * dil
    if Hout < 1:
        raise ValueError("kernel_h / dilation too large for the input height")
    if pad > W:
        # torch's cat-based circular pad silently clamps in this regime
        raise ValueError("n_adj * dilation must not exceed the point-axis length")
    CinH, CoutHout = Cin * H, Cout * Hout

    # ---- expanded weights: fold the (valid) kernel_h direction into output rows --
    # Wbig[j, co*Hout+ho, ci*H+h] = weight[co, ci, i, j] if h == ho + i*dil else 0.
    t_idx = jnp.arange(Hout)[:, None]
    h_idx = jnp.arange(H)[None, :]
    diff = h_idx - t_idx                                            # (Hout, H)
    valid = (diff >= 0) & (diff % dil == 0) & (diff // dil < KH)
    i_of = jnp.clip(diff // dil, 0, KH - 1)
    wsel = weight[:, :, i_of, :]                                    # (Cout,Cin,Hout,H,KW)
    wsel = jnp.where(valid[None, None, :, :, None], wsel, 0.0)
    wbig = jnp.transpose(wsel, (4, 0, 2, 1, 3)).reshape(KW, CoutHout, CinH)
    wbig = wbig.astype(compute_dtype)

    # ---- batch blocking (amortise per-grid-step overhead) ------------------------
    bb = _pick_batch_block(B, CinH, CoutHout, W, max_bb=max_batch_block)
    nblk = B // bb

    x2 = x.reshape(B, CinH, W)                  # free view: row index = ci*H + h
    cparams = pltpu.CompilerParams(dimension_semantics=("parallel",),
                                   vmem_limit_bytes=32 * 1024 * 1024)

    # ---- pass 1: conv -> per-block partial BN statistics (megacore-shardable) ----
    stats = pl.pallas_call(
        partial(_conv_stats_kernel, kw=KW, dil=dil, pad=pad),
        grid=(nblk,),
        in_specs=[
            pl.BlockSpec((bb, CinH, W), lambda b: (b, 0, 0)),
            pl.BlockSpec((KW, CoutHout, CinH), lambda b: (0, 0, 0)),
        ],
        out_specs=pl.BlockSpec((None, CoutHout, 2), lambda b: (b, 0, 0)),
        out_shape=jax.ShapeDtypeStruct((nblk, CoutHout, 2), jnp.float32),
        compiler_params=cparams,
    )(x2, wbig)

    # ---- tiny cross-block reduction + BN affine factors (plain JAX, O(Cout)) -----
    tot = stats.reshape(nblk, Cout, Hout, 2).sum(axis=(0, 2))       # (Cout, 2)
    n_total = float(B * Hout * W)
    mean = tot[:, 0] / n_total
    # E[x^2] - E[x]^2 in f32: can cancel if |mean| >> std (documented limitation).
    var = jnp.maximum(tot[:, 1] / n_total - mean * mean, 0.0)
    inv_std = jax.lax.rsqrt(var + eps)
    scale = gamma.astype(jnp.float32) * inv_std                     # (Cout,)
    shift = beta.astype(jnp.float32) - mean * scale
    scale_rows = jnp.repeat(scale, Hout).reshape(CoutHout, 1)       # row s = co*Hout+ho
    shift_rows = jnp.repeat(shift, Hout).reshape(CoutHout, 1)

    # ---- pass 2: recompute conv (no y HBM round-trip) + BN + LeakyReLU -----------
    out2 = pl.pallas_call(
        partial(_conv_bn_lrelu_kernel, kw=KW, dil=dil, pad=pad,
                neg_slope=neg_slope),
        grid=(nblk,),
        in_specs=[
            pl.BlockSpec((bb, CinH, W), lambda b: (b, 0, 0)),
            pl.BlockSpec((KW, CoutHout, CinH), lambda b: (0, 0, 0)),
            pl.BlockSpec((CoutHout, 1), lambda b: (0, 0)),
            pl.BlockSpec((CoutHout, 1), lambda b: (0, 0)),
        ],
        out_specs=pl.BlockSpec((bb, CoutHout, W), lambda b: (b, 0, 0)),
        out_shape=jax.ShapeDtypeStruct((B, CoutHout, W), x.dtype),
        compiler_params=cparams,
    )(x2, wbig, scale_rows, shift_rows)

    return out2.reshape(B, Cout, Hout, W)       # NCHW, no wrapper transpose


def ref_forward(x, weight, bias, gamma, beta, *, n_adj, dilation, eps=1e-5,
                neg_slope=0.01):
    """Pure-JAX reference (XLA conv) for the correctness check."""
    pad = n_adj * dilation
    xp = (jnp.concatenate([x[..., -pad:], x, x[..., :pad]], axis=3)
          if pad else x)
    y = jax.lax.conv_general_dilated(
        xp, weight, window_strides=(1, 1), padding='VALID',
        rhs_dilation=(dilation, dilation),
        dimension_numbers=('NCHW', 'OIHW', 'NCHW'))
    y = y + bias[None, :, None, None]
    mean = y.mean(axis=(0, 2, 3), keepdims=True)
    var = ((y - mean) ** 2).mean(axis=(0, 2, 3), keepdims=True)
    yn = (y - mean) * jax.lax.rsqrt(var + eps)
    yn = yn * gamma[None, :, None, None] + beta[None, :, None, None]
    return jnp.where(yn > 0, yn, neg_slope * yn)


if __name__ == "__main__":
    # small shapes consistent with the module: H is the kernel_h direction,
    # W is the circular point/sequence axis (kept lane-dense at 128).
    B, Cin, Cout = 2, 4, 8
    H, W = 4, 128
    kernel_h, n_adj, dilation = 3, 4, 1

    key = jax.random.PRNGKey(0)
    kx, kwt, kb = jax.random.split(key, 3)

    x = jax.random.normal(kx, (B, Cin, H, W), dtype=jnp.float32)

    # deterministic parameter init (PyTorch-like uniform for conv; BN gamma=1, beta=0)
    fan_in = Cin * kernel_h * (2 * n_adj + 1)
    bound = 1.0 / (fan_in ** 0.5)
    weight = jax.random.uniform(kwt, (Cout, Cin, kernel_h, 2 * n_adj + 1),
                                minval=-bound, maxval=bound, dtype=jnp.float32)
    bias = jax.random.uniform(kb, (Cout,), minval=-bound, maxval=bound,
                              dtype=jnp.float32)
    gamma = jnp.ones((Cout,), jnp.float32)
    beta = jnp.zeros((Cout,), jnp.float32)

    ref = ref_forward(x, weight, bias, gamma, beta, n_adj=n_adj, dilation=dilation)
    Hout = H - (kernel_h - 1) * dilation

    # f32 compute path: tight parity with the f32 XLA reference.
    out = basic_block2d(x, weight, bias, gamma, beta, kernel_h=kernel_h,
                        n_adj=n_adj, dilation=dilation,
                        compute_dtype=jnp.float32)
    out = jax.block_until_ready(out)
    assert out.shape == (B, Cout, Hout, W)
    assert jnp.allclose(out, ref, rtol=1e-4, atol=1e-4), \
        float(jnp.max(jnp.abs(out - ref)))

    # bf16 matmul-operand path (per review): stats / affine math stay f32, so the
    # looser tolerance only reflects bf16 quantisation of the conv operands.
    out_bf16 = basic_block2d(x, weight, bias, gamma, beta, kernel_h=kernel_h,
                             n_adj=n_adj, dilation=dilation,
                             compute_dtype=jnp.bfloat16)
    out_bf16 = jax.block_until_ready(out_bf16)
    assert jnp.allclose(out_bf16, ref, rtol=5e-2, atol=5e-2), \
        float(jnp.max(jnp.abs(out_bf16 - ref)))

    print("KERNEL_OK")
</pallas_src>

<mosaic_0001>
module attributes {stable_mosaic.version = 11 : i64} {
  func.func @_conv_stats_kernel(%arg0: i32, %arg1: memref<2x16x128xf32, #tpu.memory_space<vmem>>, %arg2: memref<9x16x16xf32, #tpu.memory_space<vmem>>, %arg3: memref<1x16x2xf32, #tpu.memory_space<vmem>>) attributes {dimension_semantics = [#tpu.dimension_semantics<parallel>], iteration_bounds = array<i64: 1>, scalar_prefetch = 0 : i64, scratch_operands = 0 : i64, tpu.core_type = #tpu.core_type<tc>, window_params = [{transform_indices = @transform_0, window_bounds = array<i64: 2, 16, 128>}, {pipeline_mode = #tpu.pipeline_mode<synchronous>, transform_indices = @transform_1, window_bounds = array<i64: 9, 16, 16>}, {transform_indices = @transform_2, window_bounds = array<i64: 1, 16, 2>}]} {
    %c0 = arith.constant 0 : index
    %c0_0 = arith.constant 0 : index
    %c0_1 = arith.constant 0 : index
    %0 = vector.load %arg1[%c0, %c0_0, %c0_1] : memref<2x16x128xf32, #tpu.memory_space<vmem>>, vector<2x16x128xf32>
    %c0_2 = arith.constant 0 : index
    %c0_3 = arith.constant 0 : index
    %c0_4 = arith.constant 0 : index
    %1 = vector.load %arg2[%c0_2, %c0_3, %c0_4] : memref<9x16x16xf32, #tpu.memory_space<vmem>>, vector<9x16x16xf32>
    %cst = arith.constant 0.000000e+00 : f32
    %2 = vector.broadcast %cst : f32 to vector<16x128xf32>
    %cst_5 = arith.constant 0.000000e+00 : f32
    %3 = vector.broadcast %cst_5 : f32 to vector<16x128xf32>
    %c4_i32 = arith.constant 4 : i32
    %4 = tpu.dynamic_rotate %0 by %c4_i32 dim 2 : vector<2x16x128xf32>, i32 -> vector<2x16x128xf32>
    %5 = vector.extract_strided_slice %1 {offsets = [0, 0, 0], sizes = [1, 16, 16], strides = [1, 1, 1]} : vector<9x16x16xf32> to vector<1x16x16xf32>
    %6 = vector.shape_cast %5 : vector<1x16x16xf32> to vector<16x16xf32>
    %7 = vector.extract_strided_slice %4 {offsets = [0, 0, 0], sizes = [1, 16, 128], strides = [1, 1, 1]} : vector<2x16x128xf32> to vector<1x16x128xf32>
    %8 = vector.shape_cast %7 : vector<1x16x128xf32> to vector<16x128xf32>
    %cst_6 = arith.constant dense<0.000000e+00> : vector<16x128xf32>
    %9 = tpu.matmul %6, %8, %cst_6 {dimension_numbers = #tpu.dot_dimension_numbers<[1], [0], [0], [1], [0, 0, 1, 1], [], []>} : vector<16x16xf32>, vector<16x128xf32>, vector<16x128xf32> -> vector<16x128xf32>
    %10 = arith.addf %2, %9 : vector<16x128xf32>
    %11 = vector.extract_strided_slice %4 {offsets = [1, 0, 0], sizes = [1, 16, 128], strides = [1, 1, 1]} : vector<2x16x128xf32> to vector<1x16x128xf32>
    %12 = vector.shape_cast %11 : vector<1x16x128xf32> to vector<16x128xf32>
    %cst_7 = arith.constant dense<0.000000e+00> : vector<16x128xf32>
    %13 = tpu.matmul %6, %12, %cst_7 {dimension_numbers = #tpu.dot_dimension_numbers<[1], [0], [0], [1], [0, 0, 1, 1], [], []>} : vector<16x16xf32>, vector<16x128xf32>, vector<16x128xf32> -> vector<16x128xf32>
    %14 = arith.addf %3, %13 : vector<16x128xf32>
    %c3_i32 = arith.constant 3 : i32
    %15 = tpu.dynamic_rotate %0 by %c3_i32 dim 2 : vector<2x16x128xf32>, i32 -> vector<2x16x128xf32>
    %16 = vector.extract_strided_slice %1 {offsets = [1, 0, 0], sizes = [1, 16, 16], strides = [1, 1, 1]} : vector<9x16x16xf32> to vector<1x16x16xf32>
    %17 = vector.shape_cast %16 : vector<1x16x16xf32> to vector<16x16xf32>
    %18 = vector.extract_strided_slice %15 {offsets = [0, 0, 0], sizes = [1, 16, 128], strides = [1, 1, 1]} : vector<2x16x128xf32> to vector<1x16x128xf32>
    %19 = vector.shape_cast %18 : vector<1x16x128xf32> to vector<16x128xf32>
    %cst_8 = arith.constant dense<0.000000e+00> : vector<16x128xf32>
    %20 = tpu.matmul %17, %19, %cst_8 {dimension_numbers = #tpu.dot_dimension_numbers<[1], [0], [0], [1], [0, 0, 1, 1], [], []>} : vector<16x16xf32>, vector<16x128xf32>, vector<16x128xf32> -> vector<16x128xf32>
    %21 = arith.addf %10, %20 : vector<16x128xf32>
    %22 = vector.extract_strided_slice %15 {offsets = [1, 0, 0], sizes = [1, 16, 128], strides = [1, 1, 1]} : vector<2x16x128xf32> to vector<1x16x128xf32>
    %23 = vector.shape_cast %22 : vector<1x16x128xf32> to vector<16x128xf32>
    %cst_9 = arith.constant dense<0.000000e+00> : vector<16x128xf32>
    %24 = tpu.matmul %17, %23, %cst_9 {dimension_numbers = #tpu.dot_dimension_numbers<[1], [0], [0], [1], [0, 0, 1, 1], [], []>} : vector<16x16xf32>, vector<16x128xf32>, vector<16x128xf32> -> vector<16x128xf32>
    %25 = arith.addf %14, %24 : vector<16x128xf32>
    %c2_i32 = arith.constant 2 : i32
    %26 = tpu.dynamic_rotate %0 by %c2_i32 dim 2 : vector<2x16x128xf32>, i32 -> vector<2x16x128xf32>
    %27 = vector.extract_strided_slice %1 {offsets = [2, 0, 0], sizes = [1, 16, 16], strides = [1, 1, 1]} : vector<9x16x16xf32> to vector<1x16x16xf32>
    %28 = vector.shape_cast %27 : vector<1x16x16xf32> to vector<16x16xf32>
    %29 = vector.extract_strided_slice %26 {offsets = [0, 0, 0], sizes = [1, 16, 128], strides = [1, 1, 1]} : vector<2x16x128xf32> to vector<1x16x128xf32>
    %30 = vector.shape_cast %29 : vector<1x16x128xf32> to vector<16x128xf32>
    %cst_10 = arith.constant dense<0.000000e+00> : vector<16x128xf32>
    %31 = tpu.matmul %28, %30, %cst_10 {dimension_numbers = #tpu.dot_dimension_numbers<[1], [0], [0], [1], [0, 0, 1, 1], [], []>} : vector<16x16xf32>, vector<16x128xf32>, vector<16x128xf32> -> vector<16x128xf32>
    %32 = arith.addf %21, %31 : vector<16x128xf32>
    %33 = vector.extract_strided_slice %26 {offsets = [1, 0, 0], sizes = [1, 16, 128], strides = [1, 1, 1]} : vector<2x16x128xf32> to vector<1x16x128xf32>
    %34 = vector.shape_cast %33 : vector<1x16x128xf32> to vector<16x128xf32>
    %cst_11 = arith.constant dense<0.000000e+00> : vector<16x128xf32>
    %35 = tpu.matmul %28, %34, %cst_11 {dimension_numbers = #tpu.dot_dimension_numbers<[1], [0], [0], [1], [0, 0, 1, 1], [], []>} : vector<16x16xf32>, vector<16x128xf32>, vector<16x128xf32> -> vector<16x128xf32>
    %36 = arith.addf %25, %35 : vector<16x128xf32>
    %c1_i32 = arith.constant 1 : i32
    %37 = tpu.dynamic_rotate %0 by %c1_i32 dim 2 : vector<2x16x128xf32>, i32 -> vector<2x16x128xf32>
    %38 = vector.extract_strided_slice %1 {offsets = [3, 0, 0], sizes = [1, 16, 16], strides = [1, 1, 1]} : vector<9x16x16xf32> to vector<1x16x16xf32>
    %39 = vector.shape_cast %38 : vector<1x16x16xf32> to vector<16x16xf32>
    %40 = vector.extract_strided_slice %37 {offsets = [0, 0, 0], sizes = [1, 16, 128], strides = [1, 1, 1]} : vector<2x16x128xf32> to vector<1x16x128xf32>
    %41 = vector.shape_cast %40 : vector<1x16x128xf32> to vector<16x128xf32>
    %cst_12 = arith.constant dense<0.000000e+00> : vector<16x128xf32>
    %42 = tpu.matmul %39, %41, %cst_12 {dimension_numbers = #tpu.dot_dimension_numbers<[1], [0], [0], [1], [0, 0, 1, 1], [], []>} : vector<16x16xf32>, vector<16x128xf32>, vector<16x128xf32> -> vector<16x128xf32>
    %43 = arith.addf %32, %42 : vector<16x128xf32>
    %44 = vector.extract_strided_slice %37 {offsets = [1, 0, 0], sizes = [1, 16, 128], strides = [1, 1, 1]} : vector<2x16x128xf32> to vector<1x16x128xf32>
    %45 = vector.shape_cast %44 : vector<1x16x128xf32> to vector<16x128xf32>
    %cst_13 = arith.constant dense<0.000000e+00> : vector<16x128xf32>
    %46 = tpu.matmul %39, %45, %cst_13 {dimension_numbers = #tpu.dot_dimension_numbers<[1], [0], [0], [1], [0, 0, 1, 1], [], []>} : vector<16x16xf32>, vector<16x128xf32>, vector<16x128xf32> -> vector<16x128xf32>
    %47 = arith.addf %36, %46 : vector<16x128xf32>
    %48 = vector.extract_strided_slice %1 {offsets = [4, 0, 0], sizes = [1, 16, 16], strides = [1, 1, 1]} : vector<9x16x16xf32> to vector<1x16x16xf32>
    %49 = vector.shape_cast %48 : vector<1x16x16xf32> to vector<16x16xf32>
    %50 = vector.extract_strided_slice %0 {offsets = [0, 0, 0], sizes = [1, 16, 128], strides = [1, 1, 1]} : vector<2x16x128xf32> to vector<1x16x128xf32>
    %51 = vector.shape_cast %50 : vector<1x16x128xf32> to vector<16x128xf32>
    %cst_14 = arith.constant dense<0.000000e+00> : vector<16x128xf32>
    %52 = tpu.matmul %49, %51, %cst_14 {dimension_numbers = #tpu.dot_dimension_numbers<[1], [0], [0], [1], [0, 0, 1, 1], [], []>} : vector<16x16xf32>, vector<16x128xf32>, vector<16x128xf32> -> vector<16x128xf32>
    %53 = arith.addf %43, %52 : vector<16x128xf32>
    %54 = vector.extract_strided_slice %0 {offsets = [1, 0, 0], sizes = [1, 16, 128], strides = [1, 1, 1]} : vector<2x16x128xf32> to vector<1x16x128xf32>
    %55 = vector.shape_cast %54 : vector<1x16x128xf32> to vector<16x128xf32>
    %cst_15 = arith.constant dense<0.000000e+00> : vector<16x128xf32>
    %56 = tpu.matmul %49, %55, %cst_15 {dimension_numbers = #tpu.dot_dimension_numbers<[1], [0], [0], [1], [0, 0, 1, 1], [], []>} : vector<16x16xf32>, vector<16x128xf32>, vector<16x128xf32> -> vector<16x128xf32>
    %57 = arith.addf %47, %56 : vector<16x128xf32>
    %c127_i32 = arith.constant 127 : i32
    %58 = tpu.dynamic_rotate %0 by %c127_i32 dim 2 : vector<2x16x128xf32>, i32 -> vector<2x16x128xf32>
    %59 = vector.extract_strided_slice %1 {offsets = [5, 0, 0], sizes = [1, 16, 16], strides = [1, 1, 1]} : vector<9x16x16xf32> to vector<1x16x16xf32>
    %60 = vector.shape_cast %59 : vector<1x16x16xf32> to vector<16x16xf32>
    %61 = vector.extract_strided_slice %58 {offsets = [0, 0, 0], sizes = [1, 16, 128], strides = [1, 1, 1]} : vector<2x16x128xf32> to vector<1x16x128xf32>
    %62 = vector.shape_cast %61 : vector<1x16x128xf32> to vector<16x128xf32>
    %cst_16 = arith.constant dense<0.000000e+00> : vector<16x128xf32>
    %63 = tpu.matmul %60, %62, %cst_16 {dimension_numbers = #tpu.dot_dimension_numbers<[1], [0], [0], [1], [0, 0, 1, 1], [], []>} : vector<16x16xf32>, vector<16x128xf32>, vector<16x128xf32> -> vector<16x128xf32>
    %64 = arith.addf %53, %63 : vector<16x128xf32>
    %65 = vector.extract_strided_slice %58 {offsets = [1, 0, 0], sizes = [1, 16, 128], strides = [1, 1, 1]} : vector<2x16x128xf32> to vector<1x16x128xf32>
    %66 = vector.shape_cast %65 : vector<1x16x128xf32> to vector<16x128xf32>
    %cst_17 = arith.constant dense<0.000000e+00> : vector<16x128xf32>
    %67 = tpu.matmul %60, %66, %cst_17 {dimension_numbers = #tpu.dot_dimension_numbers<[1], [0], [0], [1], [0, 0, 1, 1], [], []>} : vector<16x16xf32>, vector<16x128xf32>, vector<16x128xf32> -> vector<16x128xf32>
    %68 = arith.addf %57, %67 : vector<16x128xf32>
    %c126_i32 = arith.constant 126 : i32
    %69 = tpu.dynamic_rotate %0 by %c126_i32 dim 2 : vector<2x16x128xf32>, i32 -> vector<2x16x128xf32>
    %70 = vector.extract_strided_slice %1 {offsets = [6, 0, 0], sizes = [1, 16, 16], strides = [1, 1, 1]} : vector<9x16x16xf32> to vector<1x16x16xf32>
    %71 = vector.shape_cast %70 : vector<1x16x16xf32> to vector<16x16xf32>
    %72 = vector.extract_strided_slice %69 {offsets = [0, 0, 0], sizes = [1, 16, 128], strides = [1, 1, 1]} : vector<2x16x128xf32> to vector<1x16x128xf32>
    %73 = vector.shape_cast %72 : vector<1x16x128xf32> to vector<16x128xf32>
    %cst_18 = arith.constant dense<0.000000e+00> : vector<16x128xf32>
    %74 = tpu.matmul %71, %73, %cst_18 {dimension_numbers = #tpu.dot_dimension_numbers<[1], [0], [0], [1], [0, 0, 1, 1], [], []>} : vector<16x16xf32>, vector<16x128xf32>, vector<16x128xf32> -> vector<16x128xf32>
    %75 = arith.addf %64, %74 : vector<16x128xf32>
    %76 = vector.extract_strided_slice %69 {offsets = [1, 0, 0], sizes = [1, 16, 128], strides = [1, 1, 1]} : vector<2x16x128xf32> to vector<1x16x128xf32>
    %77 = vector.shape_cast %76 : vector<1x16x128xf32> to vector<16x128xf32>
    %cst_19 = arith.constant dense<0.000000e+00> : vector<16x128xf32>
    %78 = tpu.matmul %71, %77, %cst_19 {dimension_numbers = #tpu.dot_dimension_numbers<[1], [0], [0], [1], [0, 0, 1, 1], [], []>} : vector<16x16xf32>, vector<16x128xf32>, vector<16x128xf32> -> vector<16x128xf32>
    %79 = arith.addf %68, %78 : vector<16x128xf32>
    %c125_i32 = arith.constant 125 : i32
    %80 = tpu.dynamic_rotate %0 by %c125_i32 dim 2 : vector<2x16x128xf32>, i32 -> vector<2x16x128xf32>
    %81 = vector.extract_strided_slice %1 {offsets = [7, 0, 0], sizes = [1, 16, 16], strides = [1, 1, 1]} : vector<9x16x16xf32> to vector<1x16x16xf32>
    %82 = vector.shape_cast %81 : vector<1x16x16xf32> to vector<16x16xf32>
    %83 = vector.extract_strided_slice %80 {offsets = [0, 0, 0], sizes = [1, 16, 128], strides = [1, 1, 1]} : vector<2x16x128xf32> to vector<1x16x128xf32>
    %84 = vector.shape_cast %83 : vector<1x16x128xf32> to vector<16x128xf32>
    %cst_20 = arith.constant dense<0.000000e+00> : vector<16x128xf32>
    %85 = tpu.matmul %82, %84, %cst_20 {dimension_numbers = #tpu.dot_dimension_numbers<[1], [0], [0], [1], [0, 0, 1, 1], [], []>} : vector<16x16xf32>, vector<16x128xf32>, vector<16x128xf32> -> vector<16x128xf32>
    %86 = arith.addf %75, %85 : vector<16x128xf32>
    %87 = vector.extract_strided_slice %80 {offsets = [1, 0, 0], sizes = [1, 16, 128], strides = [1, 1, 1]} : vector<2x16x128xf32> to vector<1x16x128xf32>
    %88 = vector.shape_cast %87 : vector<1x16x128xf32> to vector<16x128xf32>
    %cst_21 = arith.constant dense<0.000000e+00> : vector<16x128xf32>
    %89 = tpu.matmul %82, %88, %cst_21 {dimension_numbers = #tpu.dot_dimension_numbers<[1], [0], [0], [1], [0, 0, 1, 1], [], []>} : vector<16x16xf32>, vector<16x128xf32>, vector<16x128xf32> -> vector<16x128xf32>
    %90 = arith.addf %79, %89 : vector<16x128xf32>
    %c124_i32 = arith.constant 124 : i32
    %91 = tpu.dynamic_rotate %0 by %c124_i32 dim 2 : vector<2x16x128xf32>, i32 -> vector<2x16x128xf32>
    %92 = vector.extract_strided_slice %1 {offsets = [8, 0, 0], sizes = [1, 16, 16], strides = [1, 1, 1]} : vector<9x16x16xf32> to vector<1x16x16xf32>
    %93 = vector.shape_cast %92 : vector<1x16x16xf32> to vector<16x16xf32>
    %94 = vector.extract_strided_slice %91 {offsets = [0, 0, 0], sizes = [1, 16, 128], strides = [1, 1, 1]} : vector<2x16x128xf32> to vector<1x16x128xf32>
    %95 = vector.shape_cast %94 : vector<1x16x128xf32> to vector<16x128xf32>
    %cst_22 = arith.constant dense<0.000000e+00> : vector<16x128xf32>
    %96 = tpu.matmul %93, %95, %cst_22 {dimension_numbers = #tpu.dot_dimension_numbers<[1], [0], [0], [1], [0, 0, 1, 1], [], []>} : vector<16x16xf32>, vector<16x128xf32>, vector<16x128xf32> -> vector<16x128xf32>
    %97 = arith.addf %86, %96 : vector<16x128xf32>
    %98 = vector.extract_strided_slice %91 {offsets = [1, 0, 0], sizes = [1, 16, 128], strides = [1, 1, 1]} : vector<2x16x128xf32> to vector<1x16x128xf32>
    %99 = vector.shape_cast %98 : vector<1x16x128xf32> to vector<16x128xf32>
    %cst_23 = arith.constant dense<0.000000e+00> : vector<16x128xf32>
    %100 = tpu.matmul %93, %99, %cst_23 {dimension_numbers = #tpu.dot_dimension_numbers<[1], [0], [0], [1], [0, 0, 1, 1], [], []>} : vector<16x16xf32>, vector<16x128xf32>, vector<16x128xf32> -> vector<16x128xf32>
    %101 = arith.addf %90, %100 : vector<16x128xf32>
    %102 = vector.shape_cast %97 : vector<16x128xf32> to vector<1x16x128xf32>
    %103 = vector.shape_cast %101 : vector<16x128xf32> to vector<1x16x128xf32>
    %104 = tpu.concatenate %102, %103 in 0 : vector<1x16x128xf32>, vector<1x16x128xf32> -> vector<2x16x128xf32>
    %cst_24 = arith.constant dense<0.000000e+00> : vector<16x128xf32>
    %105 = vector.multi_reduction <add>, %104, %cst_24 [0] : vector<2x16x128xf32> to vector<16x128xf32>
    %106 = arith.mulf %104, %104 : vector<2x16x128xf32>
    %cst_25 = arith.constant dense<0.000000e+00> : vector<16x128xf32>
    %107 = vector.multi_reduction <add>, %106, %cst_25 [0] : vector<2x16x128xf32> to vector<16x128xf32>
    %cst_26 = arith.constant dense<0.000000e+00> : vector<16xf32>
    %108 = vector.multi_reduction <add>, %105, %cst_26 [1] : vector<16x128xf32> to vector<16xf32>
    %109 = vector.shape_cast %108 : vector<16xf32> to vector<16x1xf32>
    %c0_27 = arith.constant 0 : index
    %c0_28 = arith.constant 0 : index
    %c0_29 = arith.constant 0 : index
    %110 = vector.load %arg3[%c0_27, %c0_28, %c0_29] : memref<1x16x2xf32, #tpu.memory_space<vmem>>, vector<1x16x1xf32>
    %111 = vector.shape_cast %110 : vector<1x16x1xf32> to vector<16x1xf32>
    %112 = vector.shape_cast %109 : vector<16x1xf32> to vector<1x16x1xf32>
    tpu.vector_store %arg3[%c0_27, %c0_28, %c0_29], %112 {strides = array<i32>} : memref<1x16x2xf32, #tpu.memory_space<vmem>>, vector<1x16x1xf32>,
    %cst_30 = arith.constant dense<0.000000e+00> : vector<16xf32>
    %113 = vector.multi_reduction <add>, %107, %cst_30 [1] : vector<16x128xf32> to vector<16xf32>
    %114 = vector.shape_cast %113 : vector<16xf32> to vector<16x1xf32>
    %c0_31 = arith.constant 0 : index
    %c0_32 = arith.constant 0 : index
    %c1 = arith.constant 1 : index
    %115 = vector.load %arg3[%c0_31, %c0_32, %c1] : memref<1x16x2xf32, #tpu.memory_space<vmem>>, vector<1x16x1xf32>
    %116 = vector.shape_cast %115 : vector<1x16x1xf32> to vector<16x1xf32>
    %117 = vector.shape_cast %114 : vector<16x1xf32> to vector<1x16x1xf32>
    tpu.vector_store %arg3[%c0_31, %c0_32, %c1], %117 {strides = array<i32>} : memref<1x16x2xf32, #tpu.memory_space<vmem>>, vector<1x16x1xf32>,
    return
  }
  func.func @transform_0(%arg0: i32) -> (i32, i32, i32) {
    %c0_i32 = arith.constant 0 : i32
    %c0_i32_0 = arith.constant 0 : i32
    %c0_i32_1 = arith.constant 0 : i32
    return %arg0, %c0_i32, %c0_i32_0 : i32, i32, i32
  }
  func.func @transform_1(%arg0: i32) -> (i32, i32, i32) {
    %c0_i32 = arith.constant 0 : i32
    %c0_i32_0 = arith.constant 0 : i32
    %c0_i32_1 = arith.constant 0 : i32
    %c0_i32_2 = arith.constant 0 : i32
    return %c0_i32, %c0_i32_0, %c0_i32_1 : i32, i32, i32
  }
  func.func @transform_2(%arg0: i32) -> (i32, i32, i32) {
    %c0_i32 = arith.constant 0 : i32
    %c0_i32_0 = arith.constant 0 : i32
    %c0_i32_1 = arith.constant 0 : i32
    return %arg0, %c0_i32, %c0_i32_0 : i32, i32, i32
  }
}

module attributes {stable_mosaic.version = 11 : i64} {
  func.func @_conv_bn_lrelu_kernel(%arg0: i32, %arg1: memref<2x16x128xf32, #tpu.memory_space<vmem>>, %arg2: memref<9x16x16xf32, #tpu.memory_space<vmem>>, %arg3: memref<16x1xf32, #tpu.memory_space<vmem>>, %arg4: memref<16x1xf32, #tpu.memory_space<vmem>>, %arg5: memref<2x16x128xf32, #tpu.memory_space<vmem>>) attributes {dimension_semantics = [#tpu.dimension_semantics<parallel>], iteration_bounds = array<i64: 1>, scalar_prefetch = 0 : i64, scratch_operands = 0 : i64, tpu.core_type = #tpu.core_type<tc>, window_params = [{transform_indices = @transform_0, window_bounds = array<i64: 2, 16, 128>}, {pipeline_mode = #tpu.pipeline_mode<synchronous>, transform_indices = @transform_1, window_bounds = array<i64: 9, 16, 16>}, {pipeline_mode = #tpu.pipeline_mode<synchronous>, transform_indices = @transform_2, window_bounds = array<i64: 16, 1>}, {pipeline_mode = #tpu.pipeline_mode<synchronous>, transform_indices = @transform_3, window_bounds = array<i64: 16, 1>}, {transform_indices = @transform_4, window_bounds = array<i64: 2, 16, 128>}]} {
    %c0 = arith.constant 0 : index
    %c0_0 = arith.constant 0 : index
    %c0_1 = arith.constant 0 : index
    %0 = vector.load %arg1[%c0, %c0_0, %c0_1] : memref<2x16x128xf32, #tpu.memory_space<vmem>>, vector<2x16x128xf32>
    %c0_2 = arith.constant 0 : index
    %c0_3 = arith.constant 0 : index
    %c0_4 = arith.constant 0 : index
    %1 = vector.load %arg2[%c0_2, %c0_3, %c0_4] : memref<9x16x16xf32, #tpu.memory_space<vmem>>, vector<9x16x16xf32>
    %cst = arith.constant 0.000000e+00 : f32
    %2 = vector.broadcast %cst : f32 to vector<16x128xf32>
    %cst_5 = arith.constant 0.000000e+00 : f32
    %3 = vector.broadcast %cst_5 : f32 to vector<16x128xf32>
    %c4_i32 = arith.constant 4 : i32
    %4 = tpu.dynamic_rotate %0 by %c4_i32 dim 2 : vector<2x16x128xf32>, i32 -> vector<2x16x128xf32>
    %5 = vector.extract_strided_slice %1 {offsets = [0, 0, 0], sizes = [1, 16, 16], strides = [1, 1, 1]} : vector<9x16x16xf32> to vector<1x16x16xf32>
    %6 = vector.shape_cast %5 : vector<1x16x16xf32> to vector<16x16xf32>
    %7 = vector.extract_strided_slice %4 {offsets = [0, 0, 0], sizes = [1, 16, 128], strides = [1, 1, 1]} : vector<2x16x128xf32> to vector<1x16x128xf32>
    %8 = vector.shape_cast %7 : vector<1x16x128xf32> to vector<16x128xf32>
    %cst_6 = arith.constant dense<0.000000e+00> : vector<16x128xf32>
    %9 = tpu.matmul %6, %8, %cst_6 {dimension_numbers = #tpu.dot_dimension_numbers<[1], [0], [0], [1], [0, 0, 1, 1], [], []>} : vector<16x16xf32>, vector<16x128xf32>, vector<16x128xf32> -> vector<16x128xf32>
    %10 = arith.addf %2, %9 : vector<16x128xf32>
    %11 = vector.extract_strided_slice %4 {offsets = [1, 0, 0], sizes = [1, 16, 128], strides = [1, 1, 1]} : vector<2x16x128xf32> to vector<1x16x128xf32>
    %12 = vector.shape_cast %11 : vector<1x16x128xf32> to vector<16x128xf32>
    %cst_7 = arith.constant dense<0.000000e+00> : vector<16x128xf32>
    %13 = tpu.matmul %6, %12, %cst_7 {dimension_numbers = #tpu.dot_dimension_numbers<[1], [0], [0], [1], [0, 0, 1, 1], [], []>} : vector<16x16xf32>, vector<16x128xf32>, vector<16x128xf32> -> vector<16x128xf32>
    %14 = arith.addf %3, %13 : vector<16x128xf32>
    %c3_i32 = arith.constant 3 : i32
    %15 = tpu.dynamic_rotate %0 by %c3_i32 dim 2 : vector<2x16x128xf32>, i32 -> vector<2x16x128xf32>
    %16 = vector.extract_strided_slice %1 {offsets = [1, 0, 0], sizes = [1, 16, 16], strides = [1, 1, 1]} : vector<9x16x16xf32> to vector<1x16x16xf32>
    %17 = vector.shape_cast %16 : vector<1x16x16xf32> to vector<16x16xf32>
    %18 = vector.extract_strided_slice %15 {offsets = [0, 0, 0], sizes = [1, 16, 128], strides = [1, 1, 1]} : vector<2x16x128xf32> to vector<1x16x128xf32>
    %19 = vector.shape_cast %18 : vector<1x16x128xf32> to vector<16x128xf32>
    %cst_8 = arith.constant dense<0.000000e+00> : vector<16x128xf32>
    %20 = tpu.matmul %17, %19, %cst_8 {dimension_numbers = #tpu.dot_dimension_numbers<[1], [0], [0], [1], [0, 0, 1, 1], [], []>} : vector<16x16xf32>, vector<16x128xf32>, vector<16x128xf32> -> vector<16x128xf32>
    %21 = arith.addf %10, %20 : vector<16x128xf32>
    %22 = vector.extract_strided_slice %15 {offsets = [1, 0, 0], sizes = [1, 16, 128], strides = [1, 1, 1]} : vector<2x16x128xf32> to vector<1x16x128xf32>
    %23 = vector.shape_cast %22 : vector<1x16x128xf32> to vector<16x128xf32>
    %cst_9 = arith.constant dense<0.000000e+00> : vector<16x128xf32>
    %24 = tpu.matmul %17, %23, %cst_9 {dimension_numbers = #tpu.dot_dimension_numbers<[1], [0], [0], [1], [0, 0, 1, 1], [], []>} : vector<16x16xf32>, vector<16x128xf32>, vector<16x128xf32> -> vector<16x128xf32>
    %25 = arith.addf %14, %24 : vector<16x128xf32>
    %c2_i32 = arith.constant 2 : i32
    %26 = tpu.dynamic_rotate %0 by %c2_i32 dim 2 : vector<2x16x128xf32>, i32 -> vector<2x16x128xf32>
    %27 = vector.extract_strided_slice %1 {offsets = [2, 0, 0], sizes = [1, 16, 16], strides = [1, 1, 1]} : vector<9x16x16xf32> to vector<1x16x16xf32>
    %28 = vector.shape_cast %27 : vector<1x16x16xf32> to vector<16x16xf32>
    %29 = vector.extract_strided_slice %26 {offsets = [0, 0, 0], sizes = [1, 16, 128], strides = [1, 1, 1]} : vector<2x16x128xf32> to vector<1x16x128xf32>
    %30 = vector.shape_cast %29 : vector<1x16x128xf32> to vector<16x128xf32>
    %cst_10 = arith.constant dense<0.000000e+00> : vector<16x128xf32>
    %31 = tpu.matmul %28, %30, %cst_10 {dimension_numbers = #tpu.dot_dimension_numbers<[1], [0], [0], [1], [0, 0, 1, 1], [], []>} : vector<16x16xf32>, vector<16x128xf32>, vector<16x128xf32> -> vector<16x128xf32>
    %32 = arith.addf %21, %31 : vector<16x128xf32>
    %33 = vector.extract_strided_slice %26 {offsets = [1, 0, 0], sizes = [1, 16, 128], strides = [1, 1, 1]} : vector<2x16x128xf32> to vector<1x16x128xf32>
    %34 = vector.shape_cast %33 : vector<1x16x128xf32> to vector<16x128xf32>
    %cst_11 = arith.constant dense<0.000000e+00> : vector<16x128xf32>
    %35 = tpu.matmul %28, %34, %cst_11 {dimension_numbers = #tpu.dot_dimension_numbers<[1], [0], [0], [1], [0, 0, 1, 1], [], []>} : vector<16x16xf32>, vector<16x128xf32>, vector<16x128xf32> -> vector<16x128xf32>
    %36 = arith.addf %25, %35 : vector<16x128xf32>
    %c1_i32 = arith.constant 1 : i32
    %37 = tpu.dynamic_rotate %0 by %c1_i32 dim 2 : vector<2x16x128xf32>, i32 -> vector<2x16x128xf32>
    %38 = vector.extract_strided_slice %1 {offsets = [3, 0, 0], sizes = [1, 16, 16], strides = [1, 1, 1]} : vector<9x16x16xf32> to vector<1x16x16xf32>
    %39 = vector.shape_cast %38 : vector<1x16x16xf32> to vector<16x16xf32>
    %40 = vector.extract_strided_slice %37 {offsets = [0, 0, 0], sizes = [1, 16, 128], strides = [1, 1, 1]} : vector<2x16x128xf32> to vector<1x16x128xf32>
    %41 = vector.shape_cast %40 : vector<1x16x128xf32> to vector<16x128xf32>
    %cst_12 = arith.constant dense<0.000000e+00> : vector<16x128xf32>
    %42 = tpu.matmul %39, %41, %cst_12 {dimension_numbers = #tpu.dot_dimension_numbers<[1], [0], [0], [1], [0, 0, 1, 1], [], []>} : vector<16x16xf32>, vector<16x128xf32>, vector<16x128xf32> -> vector<16x128xf32>
    %43 = arith.addf %32, %42 : vector<16x128xf32>
    %44 = vector.extract_strided_slice %37 {offsets = [1, 0, 0], sizes = [1, 16, 128], strides = [1, 1, 1]} : vector<2x16x128xf32> to vector<1x16x128xf32>
    %45 = vector.shape_cast %44 : vector<1x16x128xf32> to vector<16x128xf32>
    %cst_13 = arith.constant dense<0.000000e+00> : vector<16x128xf32>
    %46 = tpu.matmul %39, %45, %cst_13 {dimension_numbers = #tpu.dot_dimension_numbers<[1], [0], [0], [1], [0, 0, 1, 1], [], []>} : vector<16x16xf32>, vector<16x128xf32>, vector<16x128xf32> -> vector<16x128xf32>
    %47 = arith.addf %36, %46 : vector<16x128xf32>
    %48 = vector.extract_strided_slice %1 {offsets = [4, 0, 0], sizes = [1, 16, 16], strides = [1, 1, 1]} : vector<9x16x16xf32> to vector<1x16x16xf32>
    %49 = vector.shape_cast %48 : vector<1x16x16xf32> to vector<16x16xf32>
    %50 = vector.extract_strided_slice %0 {offsets = [0, 0, 0], sizes = [1, 16, 128], strides = [1, 1, 1]} : vector<2x16x128xf32> to vector<1x16x128xf32>
    %51 = vector.shape_cast %50 : vector<1x16x128xf32> to vector<16x128xf32>
    %cst_14 = arith.constant dense<0.000000e+00> : vector<16x128xf32>
    %52 = tpu.matmul %49, %51, %cst_14 {dimension_numbers = #tpu.dot_dimension_numbers<[1], [0], [0], [1], [0, 0, 1, 1], [], []>} : vector<16x16xf32>, vector<16x128xf32>, vector<16x128xf32> -> vector<16x128xf32>
    %53 = arith.addf %43, %52 : vector<16x128xf32>
    %54 = vector.extract_strided_slice %0 {offsets = [1, 0, 0], sizes = [1, 16, 128], strides = [1, 1, 1]} : vector<2x16x128xf32> to vector<1x16x128xf32>
    %55 = vector.shape_cast %54 : vector<1x16x128xf32> to vector<16x128xf32>
    %cst_15 = arith.constant dense<0.000000e+00> : vector<16x128xf32>
    %56 = tpu.matmul %49, %55, %cst_15 {dimension_numbers = #tpu.dot_dimension_numbers<[1], [0], [0], [1], [0, 0, 1, 1], [], []>} : vector<16x16xf32>, vector<16x128xf32>, vector<16x128xf32> -> vector<16x128xf32>
    %57 = arith.addf %47, %56 : vector<16x128xf32>
    %c127_i32 = arith.constant 127 : i32
    %58 = tpu.dynamic_rotate %0 by %c127_i32 dim 2 : vector<2x16x128xf32>, i32 -> vector<2x16x128xf32>
    %59 = vector.extract_strided_slice %1 {offsets = [5, 0, 0], sizes = [1, 16, 16], strides = [1, 1, 1]} : vector<9x16x16xf32> to vector<1x16x16xf32>
    %60 = vector.shape_cast %59 : vector<1x16x16xf32> to vector<16x16xf32>
    %61 = vector.extract_strided_slice %58 {offsets = [0, 0, 0], sizes = [1, 16, 128], strides = [1, 1, 1]} : vector<2x16x128xf32> to vector<1x16x128xf32>
    %62 = vector.shape_cast %61 : vector<1x16x128xf32> to vector<16x128xf32>
    %cst_16 = arith.constant dense<0.000000e+00> : vector<16x128xf32>
    %63 = tpu.matmul %60, %62, %cst_16 {dimension_numbers = #tpu.dot_dimension_numbers<[1], [0], [0], [1], [0, 0, 1, 1], [], []>} : vector<16x16xf32>, vector<16x128xf32>, vector<16x128xf32> -> vector<16x128xf32>
    %64 = arith.addf %53, %63 : vector<16x128xf32>
    %65 = vector.extract_strided_slice %58 {offsets = [1, 0, 0], sizes = [1, 16, 128], strides = [1, 1, 1]} : vector<2x16x128xf32> to vector<1x16x128xf32>
    %66 = vector.shape_cast %65 : vector<1x16x128xf32> to vector<16x128xf32>
    %cst_17 = arith.constant dense<0.000000e+00> : vector<16x128xf32>
    %67 = tpu.matmul %60, %66, %cst_17 {dimension_numbers = #tpu.dot_dimension_numbers<[1], [0], [0], [1], [0, 0, 1, 1], [], []>} : vector<16x16xf32>, vector<16x128xf32>, vector<16x128xf32> -> vector<16x128xf32>
    %68 = arith.addf %57, %67 : vector<16x128xf32>
    %c126_i32 = arith.constant 126 : i32
    %69 = tpu.dynamic_rotate %0 by %c126_i32 dim 2 : vector<2x16x128xf32>, i32 -> vector<2x16x128xf32>
    %70 = vector.extract_strided_slice %1 {offsets = [6, 0, 0], sizes = [1, 16, 16], strides = [1, 1, 1]} : vector<9x16x16xf32> to vector<1x16x16xf32>
    %71 = vector.shape_cast %70 : vector<1x16x16xf32> to vector<16x16xf32>
    %72 = vector.extract_strided_slice %69 {offsets = [0, 0, 0], sizes = [1, 16, 128], strides = [1, 1, 1]} : vector<2x16x128xf32> to vector<1x16x128xf32>
    %73 = vector.shape_cast %72 : vector<1x16x128xf32> to vector<16x128xf32>
    %cst_18 = arith.constant dense<0.000000e+00> : vector<16x128xf32>
    %74 = tpu.matmul %71, %73, %cst_18 {dimension_numbers = #tpu.dot_dimension_numbers<[1], [0], [0], [1], [0, 0, 1, 1], [], []>} : vector<16x16xf32>, vector<16x128xf32>, vector<16x128xf32> -> vector<16x128xf32>
    %75 = arith.addf %64, %74 : vector<16x128xf32>
    %76 = vector.extract_strided_slice %69 {offsets = [1, 0, 0], sizes = [1, 16, 128], strides = [1, 1, 1]} : vector<2x16x128xf32> to vector<1x16x128xf32>
    %77 = vector.shape_cast %76 : vector<1x16x128xf32> to vector<16x128xf32>
    %cst_19 = arith.constant dense<0.000000e+00> : vector<16x128xf32>
    %78 = tpu.matmul %71, %77, %cst_19 {dimension_numbers = #tpu.dot_dimension_numbers<[1], [0], [0], [1], [0, 0, 1, 1], [], []>} : vector<16x16xf32>, vector<16x128xf32>, vector<16x128xf32> -> vector<16x128xf32>
    %79 = arith.addf %68, %78 : vector<16x128xf32>
    %c125_i32 = arith.constant 125 : i32
    %80 = tpu.dynamic_rotate %0 by %c125_i32 dim 2 : vector<2x16x128xf32>, i32 -> vector<2x16x128xf32>
    %81 = vector.extract_strided_slice %1 {offsets = [7, 0, 0], sizes = [1, 16, 16], strides = [1, 1, 1]} : vector<9x16x16xf32> to vector<1x16x16xf32>
    %82 = vector.shape_cast %81 : vector<1x16x16xf32> to vector<16x16xf32>
    %83 = vector.extract_strided_slice %80 {offsets = [0, 0, 0], sizes = [1, 16, 128], strides = [1, 1, 1]} : vector<2x16x128xf32> to vector<1x16x128xf32>
    %84 = vector.shape_cast %83 : vector<1x16x128xf32> to vector<16x128xf32>
    %cst_20 = arith.constant dense<0.000000e+00> : vector<16x128xf32>
    %85 = tpu.matmul %82, %84, %cst_20 {dimension_numbers = #tpu.dot_dimension_numbers<[1], [0], [0], [1], [0, 0, 1, 1], [], []>} : vector<16x16xf32>, vector<16x128xf32>, vector<16x128xf32> -> vector<16x128xf32>
    %86 = arith.addf %75, %85 : vector<16x128xf32>
    %87 = vector.extract_strided_slice %80 {offsets = [1, 0, 0], sizes = [1, 16, 128], strides = [1, 1, 1]} : vector<2x16x128xf32> to vector<1x16x128xf32>
    %88 = vector.shape_cast %87 : vector<1x16x128xf32> to vector<16x128xf32>
    %cst_21 = arith.constant dense<0.000000e+00> : vector<16x128xf32>
    %89 = tpu.matmul %82, %88, %cst_21 {dimension_numbers = #tpu.dot_dimension_numbers<[1], [0], [0], [1], [0, 0, 1, 1], [], []>} : vector<16x16xf32>, vector<16x128xf32>, vector<16x128xf32> -> vector<16x128xf32>
    %90 = arith.addf %79, %89 : vector<16x128xf32>
    %c124_i32 = arith.constant 124 : i32
    %91 = tpu.dynamic_rotate %0 by %c124_i32 dim 2 : vector<2x16x128xf32>, i32 -> vector<2x16x128xf32>
    %92 = vector.extract_strided_slice %1 {offsets = [8, 0, 0], sizes = [1, 16, 16], strides = [1, 1, 1]} : vector<9x16x16xf32> to vector<1x16x16xf32>
    %93 = vector.shape_cast %92 : vector<1x16x16xf32> to vector<16x16xf32>
    %94 = vector.extract_strided_slice %91 {offsets = [0, 0, 0], sizes = [1, 16, 128], strides = [1, 1, 1]} : vector<2x16x128xf32> to vector<1x16x128xf32>
    %95 = vector.shape_cast %94 : vector<1x16x128xf32> to vector<16x128xf32>
    %cst_22 = arith.constant dense<0.000000e+00> : vector<16x128xf32>
    %96 = tpu.matmul %93, %95, %cst_22 {dimension_numbers = #tpu.dot_dimension_numbers<[1], [0], [0], [1], [0, 0, 1, 1], [], []>} : vector<16x16xf32>, vector<16x128xf32>, vector<16x128xf32> -> vector<16x128xf32>
    %97 = arith.addf %86, %96 : vector<16x128xf32>
    %98 = vector.extract_strided_slice %91 {offsets = [1, 0, 0], sizes = [1, 16, 128], strides = [1, 1, 1]} : vector<2x16x128xf32> to vector<1x16x128xf32>
    %99 = vector.shape_cast %98 : vector<1x16x128xf32> to vector<16x128xf32>
    %cst_23 = arith.constant dense<0.000000e+00> : vector<16x128xf32>
    %100 = tpu.matmul %93, %99, %cst_23 {dimension_numbers = #tpu.dot_dimension_numbers<[1], [0], [0], [1], [0, 0, 1, 1], [], []>} : vector<16x16xf32>, vector<16x128xf32>, vector<16x128xf32> -> vector<16x128xf32>
    %101 = arith.addf %90, %100 : vector<16x128xf32>
    %102 = vector.shape_cast %97 : vector<16x128xf32> to vector<1x16x128xf32>
    %103 = vector.shape_cast %101 : vector<16x128xf32> to vector<1x16x128xf32>
    %104 = tpu.concatenate %102, %103 in 0 : vector<1x16x128xf32>, vector<1x16x128xf32> -> vector<2x16x128xf32>
    %c0_24 = arith.constant 0 : index
    %c0_25 = arith.constant 0 : index
    %105 = vector.load %arg3[%c0_24, %c0_25] : memref<16x1xf32, #tpu.memory_space<vmem>>, vector<16x1xf32>
    %106 = vector.shape_cast %105 : vector<16x1xf32> to vector<1x16x1xf32>
    %107 = vector.broadcast %106 : vector<1x16x1xf32> to vector<2x16x128xf32>
    %108 = arith.mulf %104, %107 : vector<2x16x128xf32>
    %c0_26 = arith.constant 0 : index
    %c0_27 = arith.constant 0 : index
    %109 = vector.load %arg4[%c0_26, %c0_27] : memref<16x1xf32, #tpu.memory_space<vmem>>, vector<16x1xf32>
    %110 = vector.shape_cast %109 : vector<16x1xf32> to vector<1x16x1xf32>
    %111 = vector.broadcast %110 : vector<1x16x1xf32> to vector<2x16x128xf32>
    %112 = arith.addf %108, %111 : vector<2x16x128xf32>
    %cst_28 = arith.constant 0.000000e+00 : f32
    %113 = vector.broadcast %cst_28 : f32 to vector<2x16x128xf32>
    %114 = arith.cmpf ogt, %112, %113 : vector<2x16x128xf32>
    %cst_29 = arith.constant 0.00999999977 : f32
    %115 = vector.broadcast %cst_29 : f32 to vector<2x16x128xf32>
    %116 = arith.mulf %115, %112 : vector<2x16x128xf32>
    %117 = arith.select %114, %112, %116 : vector<2x16x128xi1>, vector<2x16x128xf32>
    %c0_30 = arith.constant 0 : index
    %c0_31 = arith.constant 0 : index
    %c0_32 = arith.constant 0 : index
    %118 = vector.load %arg5[%c0_30, %c0_31, %c0_32] : memref<2x16x128xf32, #tpu.memory_space<vmem>>, vector<2x16x128xf32>
    tpu.vector_store %arg5[%c0_30, %c0_31, %c0_32], %117 {strides = array<i32>} : memref<2x16x128xf32, #tpu.memory_space<vmem>>, vector<2x16x128xf32>,
    return
  }
  func.func @transform_0(%arg0: i32) -> (i32, i32, i32) {
    %c0_i32 = arith.constant 0 : i32
    %c0_i32_0 = arith.constant 0 : i32
    %c0_i32_1 = arith.constant 0 : i32
    return %arg0, %c0_i32, %c0_i32_0 : i32, i32, i32
  }
  func.func @transform_1(%arg0: i32) -> (i32, i32, i32) {
    %c0_i32 = arith.constant 0 : i32
    %c0_i32_0 = arith.constant 0 : i32
    %c0_i32_1 = arith.constant 0 : i32
    %c0_i32_2 = arith.constant 0 : i32
    return %c0_i32, %c0_i32_0, %c0_i32_1 : i32, i32, i32
  }
  func.func @transform_2(%arg0: i32) -> (i32, i32) {
    %c0_i32 = arith.constant 0 : i32
    %c0_i32_0 = arith.constant 0 : i32
    %c0_i32_1 = arith.constant 0 : i32
    return %c0_i32, %c0_i32_0 : i32, i32
  }
  func.func @transform_3(%arg0: i32) -> (i32, i32) {
    %c0_i32 = arith.constant 0 : i32
    %c0_i32_0 = arith.constant 0 : i32
    %c0_i32_1 = arith.constant 0 : i32
    return %c0_i32, %c0_i32_0 : i32, i32
  }
  func.func @transform_4(%arg0: i32) -> (i32, i32, i32) {
    %c0_i32 = arith.constant 0 : i32
    %c0_i32_0 = arith.constant 0 : i32
    %c0_i32_1 = arith.constant 0 : i32
    return %arg0, %c0_i32, %c0_i32_0 : i32, i32, i32
  }
}

</mosaic_0001>

<bundles_post_ra>
// kernel: basic_block2d.2
= control target key start
LH: loop header
LB: loop body
LE: loop exit
PB: predicated region body
PF: predicated region fallthrough
CT: control target
= control target key end

     0   :  { %vm49_vm0 = vcmask 130048   ;;  %s1982_s19 = smov 3   ;;  %s1983_s20 = smov 4   ;;  %vm1542_vm1 = vcmask 7168   ;;  %vm1549_vm2 = vcmask 15368   ;;  %s2127_s0 = inlined_call_operand.vmem [shape: f32[2,16,128], index: 0, kind: input, shape index: {}]   ;;  %s2128_s1 = inlined_call_operand.vmem [shape: f32[9,16,16], index: 1, kind: input, shape index: {}]   ;;  %s2129_s2 = inlined_call_operand.vmem [shape: f32[1,16,2], index: 2, kind: output, shape index: {}]  }
   0x1   :  { %v11_v0 = vld [vmem:[%s2127_s0] sm:$0xff]  ;;  %v12_v1 = vld [vmem:[%s2127_s0 + $0x8] sm:$0xff]  ;;  %v13_v2 = vld [vmem:[%s2127_s0 + $0x10] sm:$0xff]  ;;  %s1984_s21 = smov 2   ;;  %s1985_s22 = smov 1  }
   0x2   :  { %v1902_v3 = vpack.i.bf16 %v12_v1, %v11_v0  ;;  %v14_v4 = vld [vmem:[%s2127_s0 + $0x18] sm:$0xff]  ;;  %v17_v5 = vld [vmem:[%s2128_s1 + $0x10] sm:$0xff]  ;;  %s1986_s0 = smov 127   ;;  %s1987_s23 = smov 126   ;;  %v2022_v7 = vpack.c.bf16 %v12_v1, %v11_v0  ;;  %v15_v28 = vld [vmem:[%s2128_s1] sm:$0xff] }
   0x3   :  { %1668 = vmatprep.mubr.msk.f32.mxu0 %vm49_vm0, %v17_v5  ;;  %v1907_v6 = vpack.i.bf16 %v14_v4, %v13_v2  ;;  %1682 = vmatprep.mubr.msk.f32.mxu1 %vm49_vm0, %v17_v5  ;;  %v2024_v8 = vpack.c.bf16 %v14_v4, %v13_v2  ;;  %s1988_s24 = smov 125   ;;  %s1989_s25 = smov 124   ;;  %v18_v23 = vld [vmem:[%s2128_s1 + $0x18] sm:$0xff]  ;;  %v16_v39 = vld [vmem:[%s2128_s1 + $0x8] sm:$0xff]  ;;  %v19_v43 = vld [vmem:[%s2128_s1 + $0x20] sm:$0xff] }
   0x4   :  { %1903 = vrot.lane.b32.xlu0 %v1902_v3, %s1982_s19  ;;  %1913 = vrot.lane.b32.xlu1 %v1902_v3, %s1983_s20  ;;  %v20_v45 = vld [vmem:[%s2128_s1 + $0x28] sm:$0xff]  ;;  %v21_v46 = vld [vmem:[%s2128_s1 + $0x30] sm:$0xff] }
   0x5   :  { %v22_v51 = vld [vmem:[%s2128_s1 + $0x38] sm:$0xff]  ;;  %v23_v55 = vld [vmem:[%s2128_s1 + $0x40] sm:$0xff]  ;;  %v24_v61 = vld [vmem:[%s2128_s1 + $0x48] sm:$0xff] }
   0x6   :  { %v25_v1 = vld [vmem:[%s2128_s1 + $0x50] sm:$0xff] }
   0x8   :  { %1908 = vrot.lane.b32.xlu0 %v1907_v6, %s1982_s19  ;;  %1918 = vrot.lane.b32.xlu1 %v1907_v6, %s1983_s20 }
   0xc   :  { %1928 = vrot.lane.b32.xlu1 %v1907_v6, %s1984_s21  ;;  %1923 = vrot.lane.b32.xlu0 %v1902_v3, %s1984_s21 }
  0x10   :  { %1938 = vrot.lane.b32.xlu1 %v1907_v6, %s1985_s22  ;;  %1933 = vrot.lane.b32.xlu0 %v1902_v3, %s1985_s22 }
  0x14   :  { %1948 = vrot.lane.b32.xlu1 %v1907_v6, %s1986_s0  ;;  %1943 = vrot.lane.b32.xlu0 %v1902_v3, %s1986_s0 }
  0x18   :  { %1958 = vrot.lane.b32.xlu1 %v1907_v6, %s1987_s23  ;;  %1953 = vrot.lane.b32.xlu0 %v1902_v3, %s1987_s23 }
  0x1c   :  { %1968 = vrot.lane.b32.xlu1 %v1907_v6, %s1988_s24  ;;  %1963 = vrot.lane.b32.xlu0 %v1902_v3, %s1988_s24 }
  0x20   :  { %1978 = vrot.lane.b32.xlu1 %v1907_v6, %s1989_s25  ;;  %1973 = vrot.lane.b32.xlu0 %v1902_v3, %s1989_s25 }
  0x76   :  { %v1904_v9 = vpop.permute.xlu0 %1903  ;;  %v1914_v10 = vpop.permute.xlu1 %1913 }
  0x77   :  { %v1906_v11 = vunpack.i.h.bf16 %v1904_v9  ;;  %v1905_v12 = vunpack.i.l.bf16 %v1904_v9  ;;  %v1916_v13 = vunpack.i.h.bf16 %v1914_v10  ;;  %v1915_v14 = vunpack.i.l.bf16 %v1914_v10 }
  0x79   :  { %v1794_v15 = vpack.c.bf16 %v1916_v13, %v1915_v14  ;;  %v1790_v16 = vpack.c.bf16 %v1906_v11, %v1905_v12  ;;  %v27_v11 = vld [vmem:[%s2128_s1 + $0x60] sm:$0xff] }
  0x7a   :  { %v1909_v17 = vpop.permute.xlu0 %1908  ;;  %v1919_v18 = vpop.permute.xlu1 %1918 }
  0x7b   :  { %v1911_v19 = vunpack.i.h.bf16 %v1909_v17  ;;  %v1910_v20 = vunpack.i.l.bf16 %v1909_v17  ;;  %1791 = vmatprep.subr.bf16.mxu0 %v1790_v16  ;;  %v1921_v21 = vunpack.i.h.bf16 %v1919_v18  ;;  %v1920_v22 = vunpack.i.l.bf16 %v1919_v18  ;;  %v28_v17 = vld [vmem:[%s2128_s1 + $0x68] sm:$0xff] }
  0x7c   :  { %1793 = vmatpush3.bf16.msra.mxu0 %v1790_v16 }
  0x7d   :  { %v1802_v24 = vpack.c.bf16 %v1921_v21, %v1920_v22  ;;  %1795 = vmatprep.subr.bf16.mxu0 %v1794_v15  ;;  %v1798_v25 = vpack.c.bf16 %v1911_v19, %v1910_v20  ;;  %v29_v21 = vld [vmem:[%s2128_s1 + $0x70] sm:$0xff] }
  0x7e   :  { %v1929_v26 = vpop.permute.xlu1 %1928  ;;  %v1924_v27 = vpop.permute.xlu0 %1923 }
  0x7f   :  { %1669 = vmatmul.mubr.msk.f32.vlgmr.msra.gmra.mrb[0].mxu0 %vm49_vm0, %v18_v23  ;;  %1799 = vmatprep.subr.bf16.mxu1 %v1798_v25  ;;  %v1931_v29 = vunpack.i.h.bf16 %v1929_v26  ;;  %v1930_v30 = vunpack.i.l.bf16 %v1929_v26  ;;  %v1926_v31 = vunpack.i.h.bf16 %v1924_v27  ;;  %v1925_v32 = vunpack.i.l.bf16 %v1924_v27 }
  0x80   :  { %1797 = vmatpush3.bf16.msra.mxu0 %v1794_v15  ;;  %1801 = vmatpush3.bf16.msra.mxu1 %v1798_v25  ;;  %v32_v25 = vld [vmem:[%s2128_s1 + $0x88] sm:$0xff] }
  0x81   :  { %1803 = vmatprep.subr.bf16.mxu1 %v1802_v24  ;;  %v1810_v33 = vpack.c.bf16 %v1931_v29, %v1930_v30  ;;  %v1806_v34 = vpack.c.bf16 %v1926_v31, %v1925_v32  ;;  %1675 = vmatprep.mubr.msk.f32.mxu0 %vm49_vm0, %v15_v28 }
  0x82   :  { %v1939_v35 = vpop.permute.xlu1 %1938  ;;  %v1934_v36 = vpop.permute.xlu0 %1933 }
  0x83   :  { %1683 = vmatmul.mubr.msk.f32.vlgmr.msra.gmra.mrb[0].mxu1 %vm49_vm0, %v18_v23  ;;  %1807 = vmatprep.subr.bf16.mxu0 %v1806_v34  ;;  %v1936_v37 = vunpack.i.h.bf16 %v1934_v36  ;;  %v1935_v38 = vunpack.i.l.bf16 %v1934_v36  ;;  %v1941_v40 = vunpack.i.h.bf16 %v1939_v35  ;;  %v1940_v41 = vunpack.i.l.bf16 %v1939_v35  ;;  %v30_v23 = vld [vmem:[%s2128_s1 + $0x78] sm:$0xff] }
  0x84   :  { %1805 = vmatpush3.bf16.msra.mxu1 %v1802_v24  ;;  %1689 = vmatprep.mubr.msk.f32.mxu1 %vm49_vm0, %v15_v28  ;;  %v31_v24 = vld [vmem:[%s2128_s1 + $0x80] sm:$0xff] }
  0x85   :  { %1811 = vmatprep.subr.bf16.mxu1 %v1810_v33  ;;  %v1814_v42 = vpack.c.bf16 %v1936_v37, %v1935_v38  ;;  %v1818_v44 = vpack.c.bf16 %v1941_v40, %v1940_v41 }
  0x86   :  { %v1944_v47 = vpop.permute.xlu0 %1943  ;;  %v1949_v50 = vpop.permute.xlu1 %1948 }
  0x87   :  { %1676 = vmatmul.mubr.msk.f32.vlgmr.msra.gmra.mrb[0].mxu0 %vm49_vm0, %v16_v39  ;;  %v1946_v48 = vunpack.i.h.bf16 %v1944_v47  ;;  %v1945_v49 = vunpack.i.l.bf16 %v1944_v47  ;;  %v1951_v52 = vunpack.i.h.bf16 %v1949_v50  ;;  %v1950_v53 = vunpack.i.l.bf16 %v1949_v50 }
  0x88   :  { %1809 = vmatpush3.bf16.msra.mxu0 %v1806_v34  ;;  %1696 = vmatprep.mubr.msk.f32.mxu0 %vm49_vm0, %v19_v43 }
  0x89   :  { %1815 = vmatprep.subr.bf16.mxu0 %v1814_v42  ;;  %v1830_v54 = vpack.c.bf16 %v1946_v48, %v1945_v49  ;;  %v1834_v57 = vpack.c.bf16 %v1951_v52, %v1950_v53 }
  0x8a   :  { %v1954_v56 = vpop.permute.xlu0 %1953  ;;  %v1959_v60 = vpop.permute.xlu1 %1958 }
  0x8b   :  { %1690 = vmatmul.mubr.msk.f32.vlgmr.msra.gmra.mrb[0].mxu1 %vm49_vm0, %v16_v39  ;;  %v1956_v58 = vunpack.i.h.bf16 %v1954_v56  ;;  %v1955_v59 = vunpack.i.l.bf16 %v1954_v56  ;;  %v1961_v62 = vunpack.i.h.bf16 %v1959_v60  ;;  %v1960_v63 = vunpack.i.l.bf16 %v1959_v60 }
  0x8c   :  { %1813 = vmatpush3.bf16.msra.mxu1 %v1810_v33  ;;  %1703 = vmatprep.mubr.msk.f32.mxu1 %vm49_vm0, %v19_v43 }
  0x8d   :  { %1819 = vmatprep.subr.bf16.mxu1 %v1818_v44  ;;  %v1838_v0 = vpack.c.bf16 %v1956_v58, %v1955_v59  ;;  %v1842_v3 = vpack.c.bf16 %v1961_v62, %v1960_v63 }
  0x8e   :  { %v1964_v2 = vpop.permute.xlu0 %1963  ;;  %v1969_v6 = vpop.permute.xlu1 %1968 }
  0x8f   :  { %1697 = vmatmul.mubr.msk.f32.vlgmr.msra.gmra.mrb[0].mxu0 %vm49_vm0, %v20_v45  ;;  %v1966_v4 = vunpack.i.h.bf16 %v1964_v2  ;;  %v1965_v5 = vunpack.i.l.bf16 %v1964_v2  ;;  %v1970_v9 = vunpack.i.l.bf16 %v1969_v6 }
  0x90   :  { %1817 = vmatpush3.bf16.msra.mxu0 %v1814_v42  ;;  %1710 = vmatprep.mubr.msk.f32.mxu0 %vm49_vm0, %v21_v46 }
  0x91   :  { %1823 = vmatprep.subr.bf16.mxu0 %v2022_v7  ;;  %v1846_v10 = vpack.c.bf16 %v1966_v4, %v1965_v5 }
  0x92   :  { %v1974_v12 = vpop.permute.xlu0 %1973  ;;  %v1979_v16 = vpop.permute.xlu1 %1978 }
  0x93   :  { %1704 = vmatmul.mubr.msk.f32.vlgmr.msra.gmra.mrb[0].mxu1 %vm49_vm0, %v20_v45  ;;  %v1976_v14 = vunpack.i.h.bf16 %v1974_v12  ;;  %v1975_v15 = vunpack.i.l.bf16 %v1974_v12  ;;  %v1981_v18 = vunpack.i.h.bf16 %v1979_v16  ;;  %v1980_v19 = vunpack.i.l.bf16 %v1979_v16 }
  0x94   :  { %1821 = vmatpush3.bf16.msra.mxu1 %v1818_v44  ;;  %1717 = vmatprep.mubr.msk.f32.mxu1 %vm49_vm0, %v21_v46 }
  0x95   :  { %1827 = vmatprep.subr.bf16.mxu1 %v2024_v8  ;;  %v1854_v20 = vpack.c.bf16 %v1976_v14, %v1975_v15  ;;  %v1858_v22 = vpack.c.bf16 %v1981_v18, %v1980_v19 }
  0x97   :  { %1711 = vmatmul.mubr.msk.f32.vlgmr.msra.gmra.mrb[0].mxu0 %vm49_vm0, %v22_v51 }
  0x98   :  { %1825 = vmatpush3.bf16.msra.mxu0 %v2022_v7  ;;  %1724 = vmatprep.mubr.msk.f32.mxu0 %vm49_vm0, %v23_v55  ;;  %v26_v7 = vld [vmem:[%s2128_s1 + $0x58] sm:$0xff] }
  0x99   :  { %1831 = vmatprep.subr.bf16.mxu0 %v1830_v54 }
  0x9b   :  { %1718 = vmatmul.mubr.msk.f32.vlgmr.msra.gmra.mrb[0].mxu1 %vm49_vm0, %v22_v51 }
  0x9c   :  { %1829 = vmatpush3.bf16.msra.mxu1 %v2024_v8  ;;  %1731 = vmatprep.mubr.msk.f32.mxu1 %vm49_vm0, %v23_v55  ;;  %v1971_v8 = vunpack.i.h.bf16 %v1969_v6 }
  0x9d   :  { %1835 = vmatprep.subr.bf16.mxu1 %v1834_v57 }
  0x9e   :  { %v1850_v13 = vpack.c.bf16 %v1971_v8, %v1970_v9 }
  0x9f   :  { %1725 = vmatmul.mubr.msk.f32.vlgmr.msra.gmra.mrb[0].mxu0 %vm49_vm0, %v24_v61 }
  0xa0   :  { %1833 = vmatpush3.bf16.msra.mxu0 %v1830_v54  ;;  %1738 = vmatprep.mubr.msk.f32.mxu0 %vm49_vm0, %v25_v1 }
  0xa1   :  { %1839 = vmatprep.subr.bf16.mxu0 %v1838_v0 }
  0xa3   :  { %1732 = vmatmul.mubr.msk.f32.vlgmr.msra.gmra.mrb[0].mxu1 %vm49_vm0, %v24_v61 }
  0xa4   :  { %1837 = vmatpush3.bf16.msra.mxu1 %v1834_v57  ;;  %1745 = vmatprep.mubr.msk.f32.mxu1 %vm49_vm0, %v25_v1 }
  0xa5   :  { %1843 = vmatprep.subr.bf16.mxu1 %v1842_v3 }
  0xa7   :  { %1739 = vmatmul.mubr.msk.f32.vlgmr.msra.gmra.mrb[0].mxu0 %vm49_vm0, %v26_v7 }
  0xa8   :  { %1841 = vmatpush3.bf16.msra.mxu0 %v1838_v0  ;;  %1752 = vmatprep.mubr.msk.f32.mxu0 %vm49_vm0, %v27_v11 }
  0xa9   :  { %1847 = vmatprep.subr.bf16.mxu0 %v1846_v10 }
  0xab   :  { %1746 = vmatmul.mubr.msk.f32.vlgmr.msra.gmra.mrb[0].mxu1 %vm49_vm0, %v26_v7 }
  0xac   :  { %1845 = vmatpush3.bf16.msra.mxu1 %v1842_v3  ;;  %1759 = vmatprep.mubr.msk.f32.mxu1 %vm49_vm0, %v27_v11 }
  0xad   :  { %1851 = vmatprep.subr.bf16.mxu1 %v1850_v13 }
  0xaf   :  { %1753 = vmatmul.mubr.msk.f32.vlgmr.msra.gmra.mrb[0].mxu0 %vm49_vm0, %v28_v17 }
  0xb0   :  { %1849 = vmatpush3.bf16.msra.mxu0 %v1846_v10  ;;  %1766 = vmatprep.mubr.msk.f32.mxu0 %vm49_vm0, %v29_v21 }
  0xb1   :  { %1855 = vmatprep.subr.bf16.mxu0 %v1854_v20 }
  0xb3   :  { %1760 = vmatmul.mubr.msk.f32.vlgmr.msra.gmra.mrb[0].mxu1 %vm49_vm0, %v28_v17 }
  0xb4   :  { %1853 = vmatpush3.bf16.msra.mxu1 %v1850_v13  ;;  %1773 = vmatprep.mubr.msk.f32.mxu1 %vm49_vm0, %v29_v21 }
  0xb5   :  { %1859 = vmatprep.subr.bf16.mxu1 %v1858_v22 }
  0xb7   :  { %1767 = vmatmul.mubr.msk.f32.vlgmr.msra.gmra.mrb[0].mxu0 %vm49_vm0, %v30_v23 }
  0xb8   :  { %1857 = vmatpush3.bf16.msra.mxu0 %v1854_v20  ;;  %1780 = vmatprep.mubr.msk.f32.mxu0 %vm49_vm0, %v31_v24 }
  0xbb   :  { %1774 = vmatmul.mubr.msk.f32.vlgmr.msra.gmra.mrb[0].mxu1 %vm49_vm0, %v30_v23 }
  0xbc   :  { %1861 = vmatpush3.bf16.msra.mxu1 %v1858_v22  ;;  %1787 = vmatprep.mubr.msk.f32.mxu1 %vm49_vm0, %v31_v24 }
  0xbf   :  { %1781 = vmatmul.mubr.msk.f32.vlgmr.msra.gmra.mrb[0].mxu0 %vm49_vm0, %v32_v25 }
  0xc3   :  { %1788 = vmatmul.mubr.msk.f32.vlgmr.msra.gmra.mrb[0].mxu1 %vm49_vm0, %v32_v25 }
 0x192   :  { %v1782_v26 = vpop.f32.mrb[0].mxu0 }
 0x193   :  { %v1442_v27 = vpop.f32.mrb[1].mxu0  ;;  %v1533_v29 = vmul.f32 %v1782_v26, %v1782_v26 }
 0x194   :  { %v1532_v33 = vmul.f32 %v1442_v27, %v1442_v27 }
 0x196   :  { %v1789_v28 = vpop.f32.mrb[0].mxu1 }
 0x197   :  { %v1535_v30 = vmul.f32 %v1789_v28, %v1789_v28  ;;  %v1519_v31 = vpop.f32.mrb[1].mxu1  ;;  %v1531_v32 = vadd.f32 %v1789_v28, %v1782_v26 }
 0x198   :  { %v1530_v34 = vadd.f32 %v1519_v31, %v1442_v27  ;;  %v1534_v35 = vmul.f32 %v1519_v31, %v1519_v31 }
 0x199   :  { %1540 = vadd.xlane.f32.xlu1 %v1531_v32  ;;  %v1537_v36 = vadd.f32 %v1535_v30, %v1533_v29 }
 0x19a   :  { %1538 = vadd.xlane.f32.xlu0 %v1530_v34  ;;  %v1536_v37 = vadd.f32 %v1534_v35, %v1532_v33 }
 0x19e   :  { %1545 = vadd.xlane.f32.xlu0 %v1536_v37 }
 0x1a2   :  { %1547 = vadd.xlane.f32.xlu0 %v1537_v36 }
 0x226   :  { %v1541_v38 = vpop.xlane.xlu1 %1540 }
 0x227   :  { %1544 = vst.msk [vmem:[%s2129_s2 + $0x8] sm:$0xff] %vm1542_vm1, %v1541_v38  ;;  %v1539_v39 = vpop.xlane.xlu0 %1538 }
 0x228   :  { %1543 = vst.msk [vmem:[%s2129_s2] sm:$0xff] %vm1542_vm1, %v1539_v39 }
 0x22b   :  { %v1546_v40 = vpop.xlane.xlu0 %1545 }
 0x22c   :  { %1550 = vst.msk [vmem:[%s2129_s2] sm:$0xff] %vm1549_vm2, %v1546_v40 }
 0x22f   :  { %v1548_v41 = vpop.xlane.xlu0 %1547 }
 0x230   :  { %1551 = vst.msk [vmem:[%s2129_s2 + $0x8] sm:$0xff] %vm1549_vm2, %v1548_v41 }

// kernel: basic_block2d.3
= control target key start
LH: loop header
LB: loop body
LE: loop exit
PB: predicated region body
PF: predicated region fallthrough
CT: control target
= control target key end

     0   :  { %vm56_vm0 = vcmask 130048   ;;  %s2228_s0 = inlined_call_operand.vmem [shape: f32[2,16,128], index: 0, kind: input, shape index: {}]   ;;  %s2229_s1 = inlined_call_operand.vmem [shape: f32[9,16,16], index: 1, kind: input, shape index: {}]   ;;  %s2230_s2 = inlined_call_operand.vmem [shape: f32[16,1], index: 2, kind: input, shape index: {}]   ;;  %s2231_s3 = inlined_call_operand.vmem [shape: f32[16,1], index: 3, kind: input, shape index: {}]   ;;  %s2232_s4 = inlined_call_operand.hbm [shape: f32[2,16,128], index: 4, kind: output, shape index: {}]  }
   0x1   :  { %v18_v0 = vld [vmem:[%s2228_s0] sm:$0xff]  ;;  %v19_v1 = vld [vmem:[%s2228_s0 + $0x8] sm:$0xff]  ;;  %v20_v2 = vld [vmem:[%s2228_s0 + $0x10] sm:$0xff] }
   0x2   :  { %v1951_v3 = vpack.i.bf16 %v19_v1, %v18_v0  ;;  %v21_v4 = vld [vmem:[%s2228_s0 + $0x18] sm:$0xff]  ;;  %v24_v5 = vld [vmem:[%s2229_s1 + $0x10] sm:$0xff] }
   0x3   :  { %1713 = vmatprep.mubr.msk.f32.mxu0 %vm56_vm0, %v24_v5 }
   0x4   :  { %9 = vsyncpa [#allocation3], 0  ;;  %s2057_s25 = smov 3   ;;  %s2058_s26 = smov 4   ;;  %v1956_v6 = vpack.i.bf16 %v21_v4, %v20_v2  ;;  %1727 = vmatprep.mubr.msk.f32.mxu1 %vm56_vm0, %v24_v5  ;;  %v2111_v7 = vpack.c.bf16 %v19_v1, %v18_v0  ;;  %v2113_v8 = vpack.c.bf16 %v21_v4, %v20_v2  ;;  %v1537_v9 = vld [vmem:[%s2230_s2] sm:$0xff]  ;;  %v1538_v10 = vld [vmem:[%s2230_s2 + $0x8] sm:$0xff] }
   0x5   :  { %1952 = vrot.lane.b32.xlu0 %v1951_v3, %s2057_s25  ;;  %1962 = vrot.lane.b32.xlu1 %v1951_v3, %s2058_s26  ;;  %s2059_s27 = smov 2   ;;  %s2060_s0 = smov 1   ;;  %v2065_v11 = vmov 0   ;;  %v1554_v12 = vld [vmem:[%s2231_s3 + $0x8] sm:$0xff]  ;;  %v1553_v13 = vld [vmem:[%s2231_s3] sm:$0xff] }
   0x6   :  { %s2061_s28 = smov 127   ;;  %s2062_s29 = smov 126   ;;  %2031 = vset.pattern.permute.xlu0 %v2065_v11  ;;  %2032 = vset.pattern.permute.xlu1 %v2065_v11  ;;  %v25_v28 = vld [vmem:[%s2229_s1 + $0x18] sm:$0xff]  ;;  %v22_v33 = vld [vmem:[%s2229_s1] sm:$0xff]  ;;  %v23_v44 = vld [vmem:[%s2229_s1 + $0x8] sm:$0xff] }
   0x7   :  { %s2063_s30 = smov 125   ;;  %s2064_s5 = smov 124   ;;  %v26_v48 = vld [vmem:[%s2229_s1 + $0x20] sm:$0xff]  ;;  %v27_v50 = vld [vmem:[%s2229_s1 + $0x28] sm:$0xff]  ;;  %v28_v51 = vld [vmem:[%s2229_s1 + $0x30] sm:$0xff] }
   0x8   :  { %v29_v56 = vld [vmem:[%s2229_s1 + $0x38] sm:$0xff]  ;;  %v30_v60 = vld [vmem:[%s2229_s1 + $0x40] sm:$0xff]  ;;  %v31_v2 = vld [vmem:[%s2229_s1 + $0x48] sm:$0xff] }
   0x9   :  { %1957 = vrot.lane.b32.xlu0 %v1956_v6, %s2057_s25  ;;  %1967 = vrot.lane.b32.xlu1 %v1956_v6, %s2058_s26 }
   0xd   :  { %1977 = vrot.lane.b32.xlu1 %v1956_v6, %s2059_s27  ;;  %1972 = vrot.lane.b32.xlu0 %v1951_v3, %s2059_s27 }
  0x11   :  { %1987 = vrot.lane.b32.xlu1 %v1956_v6, %s2060_s0  ;;  %1982 = vrot.lane.b32.xlu0 %v1951_v3, %s2060_s0 }
  0x15   :  { %1997 = vrot.lane.b32.xlu1 %v1956_v6, %s2061_s28  ;;  %1992 = vrot.lane.b32.xlu0 %v1951_v3, %s2061_s28 }
  0x19   :  { %2007 = vrot.lane.b32.xlu1 %v1956_v6, %s2062_s29  ;;  %2002 = vrot.lane.b32.xlu0 %v1951_v3, %s2062_s29 }
  0x1d   :  { %2017 = vrot.lane.b32.xlu1 %v1956_v6, %s2063_s30  ;;  %2012 = vrot.lane.b32.xlu0 %v1951_v3, %s2063_s30 }
  0x21   :  { %2027 = vrot.lane.b32.xlu1 %v1956_v6, %s2064_s5  ;;  %2022 = vrot.lane.b32.xlu0 %v1951_v3, %s2064_s5  ;;  %v32_v6 = vld [vmem:[%s2229_s1 + $0x50] sm:$0xff] }
  0x25   :  { %1541 = vperm.xlu0 %2031, %v1537_v9   ;;  %1546 = vperm.xlu1 %2032, %v1538_v10  }
  0x29   :  { %1562 = vperm.xlu0 %2031, %v1554_v12   ;;  %1557 = vperm.xlu1 %2032, %v1553_v13   ;;  %v33_v12 = vld [vmem:[%s2229_s1 + $0x58] sm:$0xff] }
  0x77   :  { %v1953_v14 = vpop.permute.xlu0 %1952  ;;  %v1963_v15 = vpop.permute.xlu1 %1962 }
  0x78   :  { %v1955_v16 = vunpack.i.h.bf16 %v1953_v14  ;;  %v1954_v17 = vunpack.i.l.bf16 %v1953_v14  ;;  %v1965_v18 = vunpack.i.h.bf16 %v1963_v15  ;;  %v1964_v19 = vunpack.i.l.bf16 %v1963_v15 }
  0x7a   :  { %v1839_v20 = vpack.c.bf16 %v1965_v18, %v1964_v19  ;;  %v1835_v21 = vpack.c.bf16 %v1955_v16, %v1954_v17  ;;  %v34_v16 = vld [vmem:[%s2229_s1 + $0x60] sm:$0xff] }
  0x7b   :  { %v1958_v22 = vpop.permute.xlu0 %1957  ;;  %v1968_v23 = vpop.permute.xlu1 %1967 }
  0x7c   :  { %v1960_v24 = vunpack.i.h.bf16 %v1958_v22  ;;  %v1959_v25 = vunpack.i.l.bf16 %v1958_v22  ;;  %1836 = vmatprep.subr.bf16.mxu0 %v1835_v21  ;;  %v1970_v26 = vunpack.i.h.bf16 %v1968_v23  ;;  %v1969_v27 = vunpack.i.l.bf16 %v1968_v23  ;;  %v35_v22 = vld [vmem:[%s2229_s1 + $0x68] sm:$0xff] }
  0x7d   :  { %1838 = vmatpush3.bf16.msra.mxu0 %v1835_v21 }
  0x7e   :  { %v1847_v29 = vpack.c.bf16 %v1970_v26, %v1969_v27  ;;  %1840 = vmatprep.subr.bf16.mxu0 %v1839_v20  ;;  %v1843_v30 = vpack.c.bf16 %v1960_v24, %v1959_v25  ;;  %v36_v26 = vld [vmem:[%s2229_s1 + $0x70] sm:$0xff] }
  0x7f   :  { %v1978_v31 = vpop.permute.xlu1 %1977  ;;  %v1973_v32 = vpop.permute.xlu0 %1972 }
  0x80   :  { %1714 = vmatmul.mubr.msk.f32.vlgmr.msra.gmra.mrb[0].mxu0 %vm56_vm0, %v25_v28  ;;  %1844 = vmatprep.subr.bf16.mxu1 %v1843_v30  ;;  %v1980_v34 = vunpack.i.h.bf16 %v1978_v31  ;;  %v1979_v35 = vunpack.i.l.bf16 %v1978_v31  ;;  %v1975_v36 = vunpack.i.h.bf16 %v1973_v32  ;;  %v1974_v37 = vunpack.i.l.bf16 %v1973_v32 }
  0x81   :  { %1842 = vmatpush3.bf16.msra.mxu0 %v1839_v20  ;;  %1846 = vmatpush3.bf16.msra.mxu1 %v1843_v30  ;;  %v39_v30 = vld [vmem:[%s2229_s1 + $0x88] sm:$0xff] }
  0x82   :  { %1848 = vmatprep.subr.bf16.mxu1 %v1847_v29  ;;  %v1855_v38 = vpack.c.bf16 %v1980_v34, %v1979_v35  ;;  %v1851_v39 = vpack.c.bf16 %v1975_v36, %v1974_v37  ;;  %1720 = vmatprep.mubr.msk.f32.mxu0 %vm56_vm0, %v22_v33 }
  0x83   :  { %v1988_v40 = vpop.permute.xlu1 %1987  ;;  %v1983_v41 = vpop.permute.xlu0 %1982 }
  0x84   :  { %1728 = vmatmul.mubr.msk.f32.vlgmr.msra.gmra.mrb[0].mxu1 %vm56_vm0, %v25_v28  ;;  %1852 = vmatprep.subr.bf16.mxu0 %v1851_v39  ;;  %v1985_v42 = vunpack.i.h.bf16 %v1983_v41  ;;  %v1984_v43 = vunpack.i.l.bf16 %v1983_v41  ;;  %v1990_v45 = vunpack.i.h.bf16 %v1988_v40  ;;  %v1989_v46 = vunpack.i.l.bf16 %v1988_v40  ;;  %v37_v28 = vld [vmem:[%s2229_s1 + $0x78] sm:$0xff] }
  0x85   :  { %1850 = vmatpush3.bf16.msra.mxu1 %v1847_v29  ;;  %1734 = vmatprep.mubr.msk.f32.mxu1 %vm56_vm0, %v22_v33  ;;  %v38_v29 = vld [vmem:[%s2229_s1 + $0x80] sm:$0xff]  ;;  %s2066_s1 = smov [#allocation2]  }
  0x86   :  { %1856 = vmatprep.subr.bf16.mxu1 %v1855_v38  ;;  %v1859_v47 = vpack.c.bf16 %v1985_v42, %v1984_v43  ;;  %v1863_v49 = vpack.c.bf16 %v1990_v45, %v1989_v46  ;;  %s1590_s17 = sshll.u32 %s2066_s1, 4  ;;  %s1591_s17 = int_to_ptr.vmem [resolvable:$true] %s1590_s17 }
  0x87   :  { %v1993_v52 = vpop.permute.xlu0 %1992  ;;  %v1998_v55 = vpop.permute.xlu1 %1997  ;;  %s2033_s18 = scalar_lea.vmem %s1591_s17, 512  ;;  %p2038_p1 = scmp.lt.s32.totalorder %s1591_s17, %s1591_s17 }
  0x88   :  { %1721 = vmatmul.mubr.msk.f32.vlgmr.msra.gmra.mrb[0].mxu0 %vm56_vm0, %v23_v44  ;;  %v1995_v53 = vunpack.i.h.bf16 %v1993_v52  ;;  %v1994_v54 = vunpack.i.l.bf16 %v1993_v52  ;;  %v2000_v57 = vunpack.i.h.bf16 %v1998_v55  ;;  %v1999_v58 = vunpack.i.l.bf16 %v1998_v55  ;;  %p2034_p0 = scmp.ne.s32.totalorder %s1591_s17, %s2033_s18  ;;  %p2039_p2 = scmp.lt.s32.totalorder %s2033_s18, %s2033_s18 }
  0x89   :  { %1854 = vmatpush3.bf16.msra.mxu0 %v1851_v39  ;;  %1741 = vmatprep.mubr.msk.f32.mxu0 %vm56_vm0, %v26_v48 }
  0x8a   :  { %1860 = vmatprep.subr.bf16.mxu0 %v1859_v47  ;;  %v1875_v59 = vpack.c.bf16 %v1995_v53, %v1994_v54  ;;  %v1879_v62 = vpack.c.bf16 %v2000_v57, %v1999_v58  ;;  %p2040_p3 = por %p2039_p2, %p2038_p1 }
  0x8b   :  { %v2003_v61 = vpop.permute.xlu0 %2002  ;;  %v2008_v1 = vpop.permute.xlu1 %2007 }
  0x8c   :  { %1735 = vmatmul.mubr.msk.f32.vlgmr.msra.gmra.mrb[0].mxu1 %vm56_vm0, %v23_v44  ;;  %v2005_v63 = vunpack.i.h.bf16 %v2003_v61  ;;  %v2004_v0 = vunpack.i.l.bf16 %v2003_v61  ;;  %v2010_v3 = vunpack.i.h.bf16 %v2008_v1  ;;  %v2009_v4 = vunpack.i.l.bf16 %v2008_v1  ;;  %p2041_p4 = pnand %p2040_p3, %p2034_p0 }
  0x8d   :  { %1858 = vmatpush3.bf16.msra.mxu1 %v1855_v38  ;;  %1748 = vmatprep.mubr.msk.f32.mxu1 %vm56_vm0, %v26_v48 }
  0x8e   :  { %1864 = vmatprep.subr.bf16.mxu1 %v1863_v49  ;;  %v1883_v5 = vpack.c.bf16 %v2005_v63, %v2004_v0 }
  0x8f   :  { %v2018_v11 = vpop.permute.xlu1 %2017 }
  0x90   :  { %1742 = vmatmul.mubr.msk.f32.vlgmr.msra.gmra.mrb[0].mxu0 %vm56_vm0, %v27_v50  ;;  %v2020_v13 = vunpack.i.h.bf16 %v2018_v11  ;;  %v2019_v14 = vunpack.i.l.bf16 %v2018_v11 }
  0x91   :  { %1862 = vmatpush3.bf16.msra.mxu0 %v1859_v47  ;;  %1755 = vmatprep.mubr.msk.f32.mxu0 %vm56_vm0, %v28_v51 }
  0x92   :  { %1868 = vmatprep.subr.bf16.mxu0 %v2111_v7  ;;  %v1895_v18 = vpack.c.bf16 %v2020_v13, %v2019_v14 }
  0x93   :  { %v2028_v21 = vpop.permute.xlu1 %2027 }
  0x94   :  { %1749 = vmatmul.mubr.msk.f32.vlgmr.msra.gmra.mrb[0].mxu1 %vm56_vm0, %v27_v50  ;;  %v2030_v23 = vunpack.i.h.bf16 %v2028_v21  ;;  %v2029_v24 = vunpack.i.l.bf16 %v2028_v21 }
  0x95   :  { %1866 = vmatpush3.bf16.msra.mxu1 %v1863_v49  ;;  %1762 = vmatprep.mubr.msk.f32.mxu1 %vm56_vm0, %v28_v51 }
  0x96   :  { %1872 = vmatprep.subr.bf16.mxu1 %v2113_v8  ;;  %v1903_v27 = vpack.c.bf16 %v2030_v23, %v2029_v24 }
  0x98   :  { %1756 = vmatmul.mubr.msk.f32.vlgmr.msra.gmra.mrb[0].mxu0 %vm56_vm0, %v29_v56 }
  0x99   :  { %1870 = vmatpush3.bf16.msra.mxu0 %v2111_v7  ;;  %1769 = vmatprep.mubr.msk.f32.mxu0 %vm56_vm0, %v30_v60  ;;  %v2013_v7 = vpop.permute.xlu0 %2012 }
  0x9a   :  { %1876 = vmatprep.subr.bf16.mxu0 %v1875_v59  ;;  %v2015_v9 = vunpack.i.h.bf16 %v2013_v7  ;;  %v2014_v10 = vunpack.i.l.bf16 %v2013_v7 }
  0x9c   :  { %1763 = vmatmul.mubr.msk.f32.vlgmr.msra.gmra.mrb[0].mxu1 %vm56_vm0, %v29_v56  ;;  %v1891_v15 = vpack.c.bf16 %v2015_v9, %v2014_v10 }
  0x9d   :  { %1874 = vmatpush3.bf16.msra.mxu1 %v2113_v8  ;;  %1776 = vmatprep.mubr.msk.f32.mxu1 %vm56_vm0, %v30_v60  ;;  %v1887_v8 = vpack.c.bf16 %v2010_v3, %v2009_v4  ;;  %v2023_v17 = vpop.permute.xlu0 %2022 }
  0x9e   :  { %1880 = vmatprep.subr.bf16.mxu1 %v1879_v62  ;;  %v2025_v19 = vunpack.i.h.bf16 %v2023_v17  ;;  %v2024_v20 = vunpack.i.l.bf16 %v2023_v17 }
  0xa0   :  { %1770 = vmatmul.mubr.msk.f32.vlgmr.msra.gmra.mrb[0].mxu0 %vm56_vm0, %v31_v2  ;;  %v1899_v25 = vpack.c.bf16 %v2025_v19, %v2024_v20 }
  0xa1   :  { %1878 = vmatpush3.bf16.msra.mxu0 %v1875_v59  ;;  %1783 = vmatprep.mubr.msk.f32.mxu0 %vm56_vm0, %v32_v6 }
  0xa2   :  { %1884 = vmatprep.subr.bf16.mxu0 %v1883_v5 }
  0xa4   :  { %1777 = vmatmul.mubr.msk.f32.vlgmr.msra.gmra.mrb[0].mxu1 %vm56_vm0, %v31_v2  ;;  %v1542_v31 = vpop.permute.xlu0 %1541  ;;  %v1547_v32 = vpop.permute.xlu1 %1546 }
  0xa5   :  { %1882 = vmatpush3.bf16.msra.mxu1 %v1879_v62  ;;  %1790 = vmatprep.mubr.msk.f32.mxu1 %vm56_vm0, %v32_v6 }
  0xa6   :  { %1888 = vmatprep.subr.bf16.mxu1 %v1887_v8 }
  0xa8   :  { %1784 = vmatmul.mubr.msk.f32.vlgmr.msra.gmra.mrb[0].mxu0 %vm56_vm0, %v33_v12  ;;  %v1563_v34 = vpop.permute.xlu0 %1562  ;;  %v1558_v37 = vpop.permute.xlu1 %1557 }
  0xa9   :  { %1886 = vmatpush3.bf16.msra.mxu0 %v1883_v5  ;;  %1797 = vmatprep.mubr.msk.f32.mxu0 %vm56_vm0, %v34_v16 }
  0xaa   :  { %1892 = vmatprep.subr.bf16.mxu0 %v1891_v15 }
  0xac   :  { %1791 = vmatmul.mubr.msk.f32.vlgmr.msra.gmra.mrb[0].mxu1 %vm56_vm0, %v33_v12 }
  0xad   :  { %1890 = vmatpush3.bf16.msra.mxu1 %v1887_v8  ;;  %1804 = vmatprep.mubr.msk.f32.mxu1 %vm56_vm0, %v34_v16 }
  0xae   :  { %1896 = vmatprep.subr.bf16.mxu1 %v1895_v18 }
  0xb0   :  { %1798 = vmatmul.mubr.msk.f32.vlgmr.msra.gmra.mrb[0].mxu0 %vm56_vm0, %v35_v22 }
  0xb1   :  { %1894 = vmatpush3.bf16.msra.mxu0 %v1891_v15  ;;  %1811 = vmatprep.mubr.msk.f32.mxu0 %vm56_vm0, %v36_v26 }
  0xb2   :  { %1900 = vmatprep.subr.bf16.mxu0 %v1899_v25 }
  0xb4   :  { %1805 = vmatmul.mubr.msk.f32.vlgmr.msra.gmra.mrb[0].mxu1 %vm56_vm0, %v35_v22 }
  0xb5   :  { %1898 = vmatpush3.bf16.msra.mxu1 %v1895_v18  ;;  %1818 = vmatprep.mubr.msk.f32.mxu1 %vm56_vm0, %v36_v26 }
  0xb6   :  { %1904 = vmatprep.subr.bf16.mxu1 %v1903_v27 }
  0xb8   :  { %1812 = vmatmul.mubr.msk.f32.vlgmr.msra.gmra.mrb[0].mxu0 %vm56_vm0, %v37_v28 }
  0xb9   :  { %1902 = vmatpush3.bf16.msra.mxu0 %v1899_v25  ;;  %1825 = vmatprep.mubr.msk.f32.mxu0 %vm56_vm0, %v38_v29 }
  0xbc   :  { %1819 = vmatmul.mubr.msk.f32.vlgmr.msra.gmra.mrb[0].mxu1 %vm56_vm0, %v37_v28 }
  0xbd   :  { %1906 = vmatpush3.bf16.msra.mxu1 %v1903_v27  ;;  %1832 = vmatprep.mubr.msk.f32.mxu1 %vm56_vm0, %v38_v29 }
  0xc0   :  { %1826 = vmatmul.mubr.msk.f32.vlgmr.msra.gmra.mrb[0].mxu0 %vm56_vm0, %v39_v30 }
  0xc4   :  { %1833 = vmatmul.mubr.msk.f32.vlgmr.msra.gmra.mrb[0].mxu1 %vm56_vm0, %v39_v30 }
 0x193   :  { %v1827_v33 = vpop.f32.mrb[0].mxu0 }
 0x194   :  { %v1550_v35 = vmul.f32 %v1827_v33, %v1547_v32  ;;  %v1449_v36 = vpop.f32.mrb[1].mxu0 }
 0x195   :  { %v1549_v38 = vmul.f32 %v1542_v31, %v1449_v36 }
 0x196   :  { %v1566_v39 = vadd.f32 %v1563_v34, %v1550_v35 }
 0x197   :  { %v1565_v40 = vadd.f32 %v1558_v37, %v1549_v38  ;;  %v1834_v41 = vpop.f32.mrb[0].mxu1 }
 0x198   :  { %vm1570_vm1 = vcmp.gt.f32.partialorder %v1566_v39, 0.0  ;;  %v1574_v42 = vmul.f32 0.01, %v1566_v39  ;;  %v1552_v43 = vmul.f32 %v1834_v41, %v1547_v32  ;;  %v1526_v44 = vpop.f32.mrb[1].mxu1 }
 0x199   :  { %vm1569_vm2 = vcmp.gt.f32.partialorder %v1565_v40, 0.0  ;;  %v1573_v45 = vmul.f32 0.01, %v1565_v40  ;;  %v1551_v46 = vmul.f32 %v1542_v31, %v1526_v44 }
 0x19a   :  { %v1578_v47 = vsel %vm1570_vm1, %v1566_v39, %v1574_v42  ;;  %v1568_v48 = vadd.f32 %v1563_v34, %v1552_v43 }
 0x19b   :  { %1582 = vst [vmem:[#allocation2 + $0x8] sm:$0xff] %v1578_v47  ;;  %v1577_v49 = vsel %vm1569_vm2, %v1565_v40, %v1573_v45  ;;  %v1567_v50 = vadd.f32 %v1558_v37, %v1551_v46 }
 0x19c   :  { %1581 = vst [vmem:[#allocation2] sm:$0xff] %v1577_v49  ;;  %vm1572_vm3 = vcmp.gt.f32.partialorder %v1568_v48, 0.0  ;;  %v1576_v51 = vmul.f32 0.01, %v1568_v48 }
 0x19d   :  { %vm1571_vm4 = vcmp.gt.f32.partialorder %v1567_v50, 0.0  ;;  %v1575_v52 = vmul.f32 0.01, %v1567_v50 }
 0x19e   :  { %v1580_v53 = vsel %vm1572_vm3, %v1568_v48, %v1576_v51 }
 0x19f   :  { %1584 = vst [vmem:[#allocation2 + $0x18] sm:$0xff] %v1580_v53  ;;  %v1579_v54 = vsel %vm1571_vm4, %v1567_v50, %v1575_v52 }
 0x1a0   :  { %1583 = vst [vmem:[#allocation2 + $0x10] sm:$0xff] %v1579_v54 }
 0x1a1   :  { %2044 = shalt.err (!%p2041_p4)
}
 0x1a2   :  { %s2045_s21 = scalar_lea.hbm %s2232_s4, 512 }
 0x1a3   :  { %p2046_p5 = scmp.ne.s32.totalorder %s2232_s4, %s2045_s21  ;;  %p2049_p6 = scmp.lt.u32.totalorder %s2045_s21, %s2232_s4 }
 0x1a5   :  { %p2051_p7 = pnand %p2049_p6, %p2046_p5 }
 0x1a7   :  { %2054 = shalt.err (!%p2051_p7)
}
 0x1a8   :  { %s2067_s26 = smov 128   ;;  %s2068_s27 = smov 8  }
 0x1a9   :  { %1596 = dma.vmem_to_hbm [thread:$0]  %s1591_s17, 512, %s2232_s4, [#allocation3], %s2067_s26, %s2067_s26, %s2068_s27  }
 0x1aa   :  { %2055 = dma.done.wait [#allocation3], 512  }
 0x1ab   :  { %2056 = vsyncadd [#allocation3], 4294966784 }
 0x1ac   :  { %1600 = vsyncpa [#allocation3], 1 }

</bundles_post_ra>
